<compile_context>
chip_gen: v7x
topology: tpu7x:2x2x1
jax: 0.10.0
libtpu: 0.0.40
codegen_flags: <defaults>
</compile_context>

<pallas_src>
import functools

import jax
import jax.numpy as jnp
import numpy as np
from jax import lax
from jax.experimental import pallas as pl
from jax.experimental.pallas import tpu as pltpu

LN_EPS = 1e-5
_MiB = 2 ** 20


def _round_up(x, m):
    return (x + m - 1) // m * m


def _tpu_memory_model():
    """Return (per-core VMEM bytes, multi_tensorcore?), conservatively."""
    vmem = 64 * _MiB
    try:
        info = pltpu.get_tpu_info()
        vmem = int(getattr(info, "vmem_capacity_bytes", vmem))
    except Exception:
        pass  # fall back to v7x-like (smallest VMEM, assume 2 TCs) — always safe
    # Heuristic: 64 MiB/TC => v7x (2 TensorCores); 128 MiB => v5e/v6e (1 TC).
    multi_tc = vmem <= 64 * _MiB
    return vmem, multi_tc


def _per_lane_bytes(input_dim, hidden_dim, output_dim, x_row_major):
    """Estimated f32 VMEM bytes per lane (per point), incl. (8,128) padding."""
    if x_row_major:
        # (tile, input_dim) block: minor dim pads to 128 lanes; double-buffered.
        x_bytes = 2 * 128 * 4
    else:
        x_bytes = 2 * _round_up(input_dim, 8) * 4
    out_bytes = 2 * _round_up(output_dim, 8) * 4
    act_bytes = (6 * _round_up(hidden_dim, 8)
                 + _round_up(input_dim, 8) + _round_up(output_dim, 8)) * 4
    return x_bytes + out_bytes + act_bytes


def _choose_tile_m(M, per_lane_bytes, requested, act_budget, multi_tc):
    """Biggest lane tile that fits the VMEM activation budget (multiple of 128);
    on multi-TC chips also keep >=2 grid steps per core when M allows."""
    tile = max(128, min(_round_up(requested, 128), _round_up(M, 128)))
    max_tile = max(128, act_budget // per_lane_bytes // 128 * 128)
    tile = min(tile, max_tile)
    if multi_tc and M > 128:
        target_steps = min(4, pl.cdiv(M, 128))
        balanced = _round_up(pl.cdiv(M, target_steps), 128)
        tile = min(tile, max(128, balanced))
    return tile


@functools.lru_cache(maxsize=None)
def _nt_dot_lowers(dtype_name, k):
    """Probe (once per dtype/K): does Mosaic lower dot_general contracting both
    minor dims (W @ X^T) with a small contraction dim?  Lets us fold the x
    layout transpose into the first matmul instead of a wrapper HBM pass."""
    dtype = jnp.dtype(dtype_name)

    def probe(w_ref, x_ref, o_ref):
        o_ref[...] = lax.dot_general(
            w_ref[...], x_ref[...],
            dimension_numbers=(((1,), (1,)), ((), ())),
            preferred_element_type=jnp.float32)

    try:
        out = pl.pallas_call(
            probe,
            out_shape=jax.ShapeDtypeStruct((32, 1024), jnp.float32),
        )(jnp.ones((32, k), dtype), jnp.ones((1024, k), dtype))
        out = jax.block_until_ready(out)
        return bool(np.allclose(np.asarray(out), float(k)))
    except Exception:
        return False


def _ln_affine_act(h, g_ref, be_ref, use_siren, omega_0):
    """Fused single-pass LayerNorm over the feature axis (axis 0) + affine + act."""
    d = h.shape[0]
    inv_d = 1.0 / d
    s = jnp.sum(h, axis=0, keepdims=True)
    s2 = jnp.sum(h * h, axis=0, keepdims=True)
    mu = s * inv_d
    var = jnp.maximum(s2 * inv_d - mu * mu, 0.0)
    h = (h - mu) * lax.rsqrt(var + LN_EPS)
    h = h * g_ref[...].astype(jnp.float32) + be_ref[...].astype(jnp.float32)
    # TODO(synk): if the bundle shows VALU binding (v6e) after the bf16 switch,
    # source s=sum(h) from an extra MXU output row (append 1^T W / 1^T b to the
    # layer weights) to shave a cross-sublane reduction per layer.
    return jnp.sin(omega_0 * h) if use_siren else jnp.maximum(h, 0.0)


def _mlp_kernel(hidden_depth, use_siren, omega_0, matmul_dtype, x_feature_major,
                *refs):
    """refs = (x_ref, [w, b, gamma, beta] * hidden_depth, w_out, b_out, o_ref).

    Activations are feature-major (features, tile_m); rows on the lane axis.
    """
    x_ref = refs[0]
    o_ref = refs[-1]
    params = refs[1:-1]

    def cast(v):
        if matmul_dtype is not None and v.dtype != matmul_dtype:
            return v.astype(matmul_dtype)
        return v

    def matmul_x(w_ref):
        # First MXU op consumes the x block directly.
        if x_feature_major:
            # Fallback layout: x block is (input_dim, tile).
            return jnp.dot(cast(w_ref[...]), cast(x_ref[...]),
                           preferred_element_type=jnp.float32)
        # Row-major x block (tile, input_dim): contract the shared feature axis
        # (NT matmul), folding the layout transpose into the matmul.
        return lax.dot_general(cast(w_ref[...]), cast(x_ref[...]),
                               dimension_numbers=(((1,), (1,)), ((), ())),
                               preferred_element_type=jnp.float32)

    def matmul_h(w_ref, h):
        return jnp.dot(cast(w_ref[...]), cast(h),
                       preferred_element_type=jnp.float32)

    h = None
    for i in range(hidden_depth):
        w_ref, b_ref, g_ref, be_ref = params[4 * i: 4 * i + 4]
        lin = matmul_x(w_ref) if i == 0 else matmul_h(w_ref, h)
        h = lin + b_ref[...].astype(jnp.float32)
        h = _ln_affine_act(h, g_ref, be_ref, use_siren, omega_0)

    w_out_ref, b_out_ref = params[-2], params[-1]
    out = matmul_x(w_out_ref) if hidden_depth == 0 else matmul_h(w_out_ref, h)
    out = out + b_out_ref[...].astype(jnp.float32)
    o_ref[...] = out.astype(o_ref.dtype)          # lane-dense (out_dim, tile) store


def coordinate_mlp_pallas(x, params, *, hidden_depth, use_siren=False,
                          omega_0=30.0, tile_m=32768,
                          matmul_dtype=jnp.bfloat16,
                          feature_major_output=False):
    """Forward pass of CoordinateMLP (skip_connection_dim=0, use_film=False).

    x: (B, N, input_dim).  params: torch layout, per hidden layer
    [W (out,in), b (out,1), gamma (out,1), beta (out,1)], then [W_out, b_out].
    Returns (B, N, output_dim), or the feature-major (output_dim, B*N) slab if
    feature_major_output=True (skips the minor-dim-4 wrapper transpose).
    """
    B, N, input_dim = x.shape
    M = B * N
    hidden_dim = params[0].shape[0] if hidden_depth > 0 else params[-2].shape[1]
    output_dim = params[-2].shape[0]
    out_dtype = x.dtype
    if matmul_dtype is not None:
        matmul_dtype = jnp.dtype(matmul_dtype)

    # Can the first-layer NT matmul be lowered?  If not, fall back to one
    # wrapper-side transpose of x (the previously validated path).
    probe_dtype = matmul_dtype.name if matmul_dtype is not None else "float32"
    x_feature_major = not _nt_dot_lowers(probe_dtype, int(input_dim))

    # Generation-aware VMEM budgeting.
    vmem_bytes, multi_tc = _tpu_memory_model()
    vmem_cap = max(32 * _MiB, vmem_bytes - 24 * _MiB)
    param_bytes = sum(int(np.prod(p.shape)) * p.dtype.itemsize for p in params)
    overhead = 8 * param_bytes + 8 * _MiB          # param copies + compiler scratch
    per_lane = _per_lane_bytes(input_dim, hidden_dim, output_dim,
                               x_row_major=not x_feature_major)
    act_budget = max(per_lane * 128,
                     min(int(0.75 * vmem_cap), vmem_cap - overhead))
    tile = _choose_tile_m(M, per_lane, tile_m, act_budget, multi_tc)
    act_bytes = per_lane * tile
    vmem_limit = int(min(vmem_cap, max(32 * _MiB, act_bytes + overhead)))

    x2d = x.reshape(M, input_dim)                  # contiguous: no HBM pass
    if x_feature_major:
        x_in = jnp.transpose(x2d)                  # fallback: one extra HBM pass
        x_spec = pl.BlockSpec((input_dim, tile), lambda i: (0, i))
    else:
        x_in = x2d                                 # row-major, no wrapper pass
        x_spec = pl.BlockSpec((tile, input_dim), lambda i: (i, 0))

    # Ragged M: cdiv grid; OOB tail lanes are garbage but every op is lane-local
    # (LN / matmuls contract over features only) and OOB writes are masked.
    grid = (pl.cdiv(M, tile),)
    out_spec = pl.BlockSpec((output_dim, tile), lambda i: (0, i))
    # Constant index_map: each parameter is DMA'd once for the whole grid.
    param_specs = [pl.BlockSpec(p.shape, lambda i: (0, 0)) for p in params]
    # NOTE: pipeline_mode=pl.Buffered(3) on x_spec could hide DMA issue latency
    # for very small tiles, but is irrelevant at the large default tiles.

    kernel = functools.partial(_mlp_kernel, hidden_depth, use_siren, omega_0,
                               matmul_dtype, x_feature_major)
    outT = pl.pallas_call(
        kernel,
        out_shape=jax.ShapeDtypeStruct((output_dim, M), out_dtype),
        grid=grid,
        in_specs=[x_spec] + param_specs,
        out_specs=out_spec,
        compiler_params=pltpu.CompilerParams(
            dimension_semantics=("parallel",),
            vmem_limit_bytes=vmem_limit),
    )(x_in, *params)

    if feature_major_output:
        return outT
    return jnp.transpose(outT).reshape(B, N, output_dim)


def init_params(key, input_dim, hidden_dim, hidden_depth, output_dim):
    """Deterministic init mimicking nn.Linear defaults + LayerNorm(1, 0).

    Weights in torch layout (out_features, in_features); biases and LayerNorm
    gamma/beta as (features, 1) columns (feature-major kernel)."""
    params = []
    fan_in = input_dim
    for _ in range(hidden_depth):
        key, kw, kb = jax.random.split(key, 3)
        bound = 1.0 / np.sqrt(fan_in)
        w = jax.random.uniform(kw, (hidden_dim, fan_in), jnp.float32, -bound, bound)
        b = jax.random.uniform(kb, (hidden_dim, 1), jnp.float32, -bound, bound)
        gamma = jnp.ones((hidden_dim, 1), jnp.float32)
        beta = jnp.zeros((hidden_dim, 1), jnp.float32)
        params += [w, b, gamma, beta]
        fan_in = hidden_dim
    key, kw, kb = jax.random.split(key, 3)
    bound = 1.0 / np.sqrt(fan_in)
    w_out = jax.random.uniform(kw, (output_dim, fan_in), jnp.float32, -bound, bound)
    b_out = jax.random.uniform(kb, (output_dim, 1), jnp.float32, -bound, bound)
    params += [w_out, b_out]
    return params


def coordinate_mlp_ref(x, params, *, hidden_depth, use_siren=False, omega_0=30.0):
    """Pure-JAX reference matching CoordinateMLP.forward (default config)."""
    B, N, D = x.shape
    h = x.reshape(B * N, D).astype(jnp.float32)
    for i in range(hidden_depth):
        w, b, g, be = params[4 * i: 4 * i + 4]
        h = h @ w.astype(jnp.float32).T + b.astype(jnp.float32).reshape(1, -1)
        mu = jnp.mean(h, axis=-1, keepdims=True)
        var = jnp.mean(jnp.square(h - mu), axis=-1, keepdims=True)
        h = (h - mu) / jnp.sqrt(var + LN_EPS)
        h = h * g.reshape(1, -1) + be.reshape(1, -1)
        h = jnp.sin(omega_0 * h) if use_siren else jnp.maximum(h, 0.0)
    out = h @ params[-2].astype(jnp.float32).T + params[-1].astype(jnp.float32).reshape(1, -1)
    return out.reshape(B, N, -1)


if __name__ == "__main__":
    # Small shapes consistent with forward: x (B, N, input_dim).
    # N=200 exercises ragged-M masking and the tile-choice logic.
    B, N = 2, 200
    input_dim, hidden_dim, hidden_depth, output_dim = 4, 32, 3, 4

    key = jax.random.PRNGKey(0)
    key, kx = jax.random.split(key)
    x = jax.random.normal(kx, (B, N, input_dim), jnp.float32)
    params = init_params(key, input_dim, hidden_dim, hidden_depth, output_dim)

    ref = coordinate_mlp_ref(x, params, hidden_depth=hidden_depth)

    # 1) f32 MXU path — tight tolerance.
    out_f32 = coordinate_mlp_pallas(x, params, hidden_depth=hidden_depth,
                                    matmul_dtype=None)
    out_f32 = jax.block_until_ready(out_f32)
    np.testing.assert_allclose(np.asarray(out_f32), np.asarray(ref),
                               rtol=1e-4, atol=1e-5)

    # 2) Forced small tile: multi-step grid + ragged masked last block.
    out_tiled = coordinate_mlp_pallas(x, params, hidden_depth=hidden_depth,
                                      matmul_dtype=None, tile_m=128)
    out_tiled = jax.block_until_ready(out_tiled)
    np.testing.assert_allclose(np.asarray(out_tiled), np.asarray(ref),
                               rtol=1e-4, atol=1e-5)

    # 3) Default path: bf16 MXU (LN / biases / gamma-beta / activation in f32).
    out_bf16 = coordinate_mlp_pallas(x, params, hidden_depth=hidden_depth)
    out_bf16 = jax.block_until_ready(out_bf16)
    np.testing.assert_allclose(np.asarray(out_bf16), np.asarray(ref),
                               rtol=0.1, atol=0.1)

    # 4) SIREN activation variant (f32 matmuls: sin amplifies rounding).
    ref_sin = coordinate_mlp_ref(x, params, hidden_depth=hidden_depth,
                                 use_siren=True)
    out_sin = coordinate_mlp_pallas(x, params, hidden_depth=hidden_depth,
                                    use_siren=True, matmul_dtype=None)
    out_sin = jax.block_until_ready(out_sin)
    np.testing.assert_allclose(np.asarray(out_sin), np.asarray(ref_sin),
                               rtol=2e-2, atol=2e-2)

    print("KERNEL_OK")
</pallas_src>

<mosaic_0001>
module attributes {stable_mosaic.version = 11 : i64} {
  func.func @probe(%arg0: memref<32x4xf32, #tpu.memory_space<vmem>>, %arg1: memref<1024x4xf32, #tpu.memory_space<vmem>>, %arg2: memref<32x1024xf32, #tpu.memory_space<vmem>>) attributes {dimension_semantics = [], scalar_prefetch = 0 : i64, scratch_operands = 0 : i64, tpu.core_type = #tpu.core_type<tc>} {
    %c0 = arith.constant 0 : index
    %c0_0 = arith.constant 0 : index
    %0 = vector.load %arg0[%c0, %c0_0] : memref<32x4xf32, #tpu.memory_space<vmem>>, vector<32x4xf32>
    %c0_1 = arith.constant 0 : index
    %c0_2 = arith.constant 0 : index
    %1 = vector.load %arg1[%c0_1, %c0_2] : memref<1024x4xf32, #tpu.memory_space<vmem>>, vector<1024x4xf32>
    %cst = arith.constant dense<0.000000e+00> : vector<32x1024xf32>
    %2 = tpu.matmul %0, %1, %cst {dimension_numbers = #tpu.dot_dimension_numbers<[1], [1], [0], [0], [0, 0, 1, 0], [], []>} : vector<32x4xf32>, vector<1024x4xf32>, vector<32x1024xf32> -> vector<32x1024xf32>
    %c0_3 = arith.constant 0 : index
    %c0_4 = arith.constant 0 : index
    %3 = vector.load %arg2[%c0_3, %c0_4] : memref<32x1024xf32, #tpu.memory_space<vmem>>, vector<32x1024xf32>
    tpu.vector_store %arg2[%c0_3, %c0_4], %2 {strides = array<i32>} : memref<32x1024xf32, #tpu.memory_space<vmem>>, vector<32x1024xf32>,
    return
  }
}

module attributes {stable_mosaic.version = 11 : i64} {
  func.func @_mlp_kernel(%arg0: i32, %arg1: memref<4x128xf32, #tpu.memory_space<vmem>>, %arg2: memref<32x4xf32, #tpu.memory_space<vmem>>, %arg3: memref<32x1xf32, #tpu.memory_space<vmem>>, %arg4: memref<32x1xf32, #tpu.memory_space<vmem>>, %arg5: memref<32x1xf32, #tpu.memory_space<vmem>>, %arg6: memref<32x32xf32, #tpu.memory_space<vmem>>, %arg7: memref<32x1xf32, #tpu.memory_space<vmem>>, %arg8: memref<32x1xf32, #tpu.memory_space<vmem>>, %arg9: memref<32x1xf32, #tpu.memory_space<vmem>>, %arg10: memref<32x32xf32, #tpu.memory_space<vmem>>, %arg11: memref<32x1xf32, #tpu.memory_space<vmem>>, %arg12: memref<32x1xf32, #tpu.memory_space<vmem>>, %arg13: memref<32x1xf32, #tpu.memory_space<vmem>>, %arg14: memref<4x32xf32, #tpu.memory_space<vmem>>, %arg15: memref<4x1xf32, #tpu.memory_space<vmem>>, %arg16: memref<4x128xf32, #tpu.memory_space<vmem>>) attributes {dimension_semantics = [#tpu.dimension_semantics<parallel>], iteration_bounds = array<i64: 4>, scalar_prefetch = 0 : i64, scratch_operands = 0 : i64, tpu.core_type = #tpu.core_type<tc>, window_params = [{transform_indices = @transform_0, window_bounds = array<i64: 4, 128>}, {pipeline_mode = #tpu.pipeline_mode<synchronous>, transform_indices = @transform_1, window_bounds = array<i64: 32, 4>}, {pipeline_mode = #tpu.pipeline_mode<synchronous>, transform_indices = @transform_2, window_bounds = array<i64: 32, 1>}, {pipeline_mode = #tpu.pipeline_mode<synchronous>, transform_indices = @transform_3, window_bounds = array<i64: 32, 1>}, {pipeline_mode = #tpu.pipeline_mode<synchronous>, transform_indices = @transform_4, window_bounds = array<i64: 32, 1>}, {pipeline_mode = #tpu.pipeline_mode<synchronous>, transform_indices = @transform_5, window_bounds = array<i64: 32, 32>}, {pipeline_mode = #tpu.pipeline_mode<synchronous>, transform_indices = @transform_6, window_bounds = array<i64: 32, 1>}, {pipeline_mode = #tpu.pipeline_mode<synchronous>, transform_indices = @transform_7, window_bounds = array<i64: 32, 1>}, {pipeline_mode = #tpu.pipeline_mode<synchronous>, transform_indices = @transform_8, window_bounds = array<i64: 32, 1>}, {pipeline_mode = #tpu.pipeline_mode<synchronous>, transform_indices = @transform_9, window_bounds = array<i64: 32, 32>}, {pipeline_mode = #tpu.pipeline_mode<synchronous>, transform_indices = @transform_10, window_bounds = array<i64: 32, 1>}, {pipeline_mode = #tpu.pipeline_mode<synchronous>, transform_indices = @transform_11, window_bounds = array<i64: 32, 1>}, {pipeline_mode = #tpu.pipeline_mode<synchronous>, transform_indices = @transform_12, window_bounds = array<i64: 32, 1>}, {pipeline_mode = #tpu.pipeline_mode<synchronous>, transform_indices = @transform_13, window_bounds = array<i64: 4, 32>}, {pipeline_mode = #tpu.pipeline_mode<synchronous>, transform_indices = @transform_14, window_bounds = array<i64: 4, 1>}, {transform_indices = @transform_15, window_bounds = array<i64: 4, 128>}]} {
    %c0 = arith.constant 0 : index
    %c0_0 = arith.constant 0 : index
    %0 = vector.load %arg2[%c0, %c0_0] : memref<32x4xf32, #tpu.memory_space<vmem>>, vector<32x4xf32>
    %c0_1 = arith.constant 0 : index
    %c0_2 = arith.constant 0 : index
    %1 = vector.load %arg1[%c0_1, %c0_2] : memref<4x128xf32, #tpu.memory_space<vmem>>, vector<4x128xf32>
    %cst = arith.constant dense<0.000000e+00> : vector<32x128xf32>
    %2 = tpu.matmul %0, %1, %cst {dimension_numbers = #tpu.dot_dimension_numbers<[1], [0], [0], [1], [0, 0, 1, 1], [], []>} : vector<32x4xf32>, vector<4x128xf32>, vector<32x128xf32> -> vector<32x128xf32>
    %c0_3 = arith.constant 0 : index
    %c0_4 = arith.constant 0 : index
    %3 = vector.load %arg3[%c0_3, %c0_4] : memref<32x1xf32, #tpu.memory_space<vmem>>, vector<32x1xf32>
    %4 = vector.broadcast %3 : vector<32x1xf32> to vector<32x128xf32>
    %5 = arith.addf %2, %4 : vector<32x128xf32>
    %cst_5 = arith.constant dense<0.000000e+00> : vector<128xf32>
    %6 = vector.multi_reduction <add>, %5, %cst_5 [0] : vector<32x128xf32> to vector<128xf32>
    %7 = vector.shape_cast %6 : vector<128xf32> to vector<1x128xf32>
    %8 = arith.mulf %5, %5 : vector<32x128xf32>
    %cst_6 = arith.constant dense<0.000000e+00> : vector<128xf32>
    %9 = vector.multi_reduction <add>, %8, %cst_6 [0] : vector<32x128xf32> to vector<128xf32>
    %10 = vector.shape_cast %9 : vector<128xf32> to vector<1x128xf32>
    %cst_7 = arith.constant 3.125000e-02 : f32
    %11 = vector.broadcast %cst_7 : f32 to vector<1x128xf32>
    %12 = arith.mulf %7, %11 : vector<1x128xf32>
    %cst_8 = arith.constant 3.125000e-02 : f32
    %13 = vector.broadcast %cst_8 : f32 to vector<1x128xf32>
    %14 = arith.mulf %10, %13 : vector<1x128xf32>
    %15 = arith.mulf %12, %12 : vector<1x128xf32>
    %16 = arith.subf %14, %15 : vector<1x128xf32>
    %cst_9 = arith.constant 0.000000e+00 : f32
    %17 = vector.broadcast %cst_9 : f32 to vector<1x128xf32>
    %18 = arith.maximumf %16, %17 : vector<1x128xf32>
    %19 = vector.broadcast %12 : vector<1x128xf32> to vector<32x128xf32>
    %20 = arith.subf %5, %19 : vector<32x128xf32>
    %cst_10 = arith.constant 9.99999974E-6 : f32
    %21 = vector.broadcast %cst_10 : f32 to vector<1x128xf32>
    %22 = arith.addf %18, %21 : vector<1x128xf32>
    %23 = math.rsqrt %22 : vector<1x128xf32>
    %24 = vector.broadcast %23 : vector<1x128xf32> to vector<32x128xf32>
    %25 = arith.mulf %20, %24 : vector<32x128xf32>
    %c0_11 = arith.constant 0 : index
    %c0_12 = arith.constant 0 : index
    %26 = vector.load %arg4[%c0_11, %c0_12] : memref<32x1xf32, #tpu.memory_space<vmem>>, vector<32x1xf32>
    %27 = vector.broadcast %26 : vector<32x1xf32> to vector<32x128xf32>
    %28 = arith.mulf %25, %27 : vector<32x128xf32>
    %c0_13 = arith.constant 0 : index
    %c0_14 = arith.constant 0 : index
    %29 = vector.load %arg5[%c0_13, %c0_14] : memref<32x1xf32, #tpu.memory_space<vmem>>, vector<32x1xf32>
    %30 = vector.broadcast %29 : vector<32x1xf32> to vector<32x128xf32>
    %31 = arith.addf %28, %30 : vector<32x128xf32>
    %cst_15 = arith.constant 0.000000e+00 : f32
    %32 = vector.broadcast %cst_15 : f32 to vector<32x128xf32>
    %33 = arith.maximumf %31, %32 : vector<32x128xf32>
    %c0_16 = arith.constant 0 : index
    %c0_17 = arith.constant 0 : index
    %34 = vector.load %arg6[%c0_16, %c0_17] : memref<32x32xf32, #tpu.memory_space<vmem>>, vector<32x32xf32>
    %cst_18 = arith.constant dense<0.000000e+00> : vector<32x128xf32>
    %35 = tpu.matmul %34, %33, %cst_18 {dimension_numbers = #tpu.dot_dimension_numbers<[1], [0], [0], [1], [0, 0, 1, 1], [], []>} : vector<32x32xf32>, vector<32x128xf32>, vector<32x128xf32> -> vector<32x128xf32>
    %c0_19 = arith.constant 0 : index
    %c0_20 = arith.constant 0 : index
    %36 = vector.load %arg7[%c0_19, %c0_20] : memref<32x1xf32, #tpu.memory_space<vmem>>, vector<32x1xf32>
    %37 = vector.broadcast %36 : vector<32x1xf32> to vector<32x128xf32>
    %38 = arith.addf %35, %37 : vector<32x128xf32>
    %cst_21 = arith.constant dense<0.000000e+00> : vector<128xf32>
    %39 = vector.multi_reduction <add>, %38, %cst_21 [0] : vector<32x128xf32> to vector<128xf32>
    %40 = vector.shape_cast %39 : vector<128xf32> to vector<1x128xf32>
    %41 = arith.mulf %38, %38 : vector<32x128xf32>
    %cst_22 = arith.constant dense<0.000000e+00> : vector<128xf32>
    %42 = vector.multi_reduction <add>, %41, %cst_22 [0] : vector<32x128xf32> to vector<128xf32>
    %43 = vector.shape_cast %42 : vector<128xf32> to vector<1x128xf32>
    %cst_23 = arith.constant 3.125000e-02 : f32
    %44 = vector.broadcast %cst_23 : f32 to vector<1x128xf32>
    %45 = arith.mulf %40, %44 : vector<1x128xf32>
    %cst_24 = arith.constant 3.125000e-02 : f32
    %46 = vector.broadcast %cst_24 : f32 to vector<1x128xf32>
    %47 = arith.mulf %43, %46 : vector<1x128xf32>
    %48 = arith.mulf %45, %45 : vector<1x128xf32>
    %49 = arith.subf %47, %48 : vector<1x128xf32>
    %cst_25 = arith.constant 0.000000e+00 : f32
    %50 = vector.broadcast %cst_25 : f32 to vector<1x128xf32>
    %51 = arith.maximumf %49, %50 : vector<1x128xf32>
    %52 = vector.broadcast %45 : vector<1x128xf32> to vector<32x128xf32>
    %53 = arith.subf %38, %52 : vector<32x128xf32>
    %cst_26 = arith.constant 9.99999974E-6 : f32
    %54 = vector.broadcast %cst_26 : f32 to vector<1x128xf32>
    %55 = arith.addf %51, %54 : vector<1x128xf32>
    %56 = math.rsqrt %55 : vector<1x128xf32>
    %57 = vector.broadcast %56 : vector<1x128xf32> to vector<32x128xf32>
    %58 = arith.mulf %53, %57 : vector<32x128xf32>
    %c0_27 = arith.constant 0 : index
    %c0_28 = arith.constant 0 : index
    %59 = vector.load %arg8[%c0_27, %c0_28] : memref<32x1xf32, #tpu.memory_space<vmem>>, vector<32x1xf32>
    %60 = vector.broadcast %59 : vector<32x1xf32> to vector<32x128xf32>
    %61 = arith.mulf %58, %60 : vector<32x128xf32>
    %c0_29 = arith.constant 0 : index
    %c0_30 = arith.constant 0 : index
    %62 = vector.load %arg9[%c0_29, %c0_30] : memref<32x1xf32, #tpu.memory_space<vmem>>, vector<32x1xf32>
    %63 = vector.broadcast %62 : vector<32x1xf32> to vector<32x128xf32>
    %64 = arith.addf %61, %63 : vector<32x128xf32>
    %cst_31 = arith.constant 0.000000e+00 : f32
    %65 = vector.broadcast %cst_31 : f32 to vector<32x128xf32>
    %66 = arith.maximumf %64, %65 : vector<32x128xf32>
    %c0_32 = arith.constant 0 : index
    %c0_33 = arith.constant 0 : index
    %67 = vector.load %arg10[%c0_32, %c0_33] : memref<32x32xf32, #tpu.memory_space<vmem>>, vector<32x32xf32>
    %cst_34 = arith.constant dense<0.000000e+00> : vector<32x128xf32>
    %68 = tpu.matmul %67, %66, %cst_34 {dimension_numbers = #tpu.dot_dimension_numbers<[1], [0], [0], [1], [0, 0, 1, 1], [], []>} : vector<32x32xf32>, vector<32x128xf32>, vector<32x128xf32> -> vector<32x128xf32>
    %c0_35 = arith.constant 0 : index
    %c0_36 = arith.constant 0 : index
    %69 = vector.load %arg11[%c0_35, %c0_36] : memref<32x1xf32, #tpu.memory_space<vmem>>, vector<32x1xf32>
    %70 = vector.broadcast %69 : vector<32x1xf32> to vector<32x128xf32>
    %71 = arith.addf %68, %70 : vector<32x128xf32>
    %cst_37 = arith.constant dense<0.000000e+00> : vector<128xf32>
    %72 = vector.multi_reduction <add>, %71, %cst_37 [0] : vector<32x128xf32> to vector<128xf32>
    %73 = vector.shape_cast %72 : vector<128xf32> to vector<1x128xf32>
    %74 = arith.mulf %71, %71 : vector<32x128xf32>
    %cst_38 = arith.constant dense<0.000000e+00> : vector<128xf32>
    %75 = vector.multi_reduction <add>, %74, %cst_38 [0] : vector<32x128xf32> to vector<128xf32>
    %76 = vector.shape_cast %75 : vector<128xf32> to vector<1x128xf32>
    %cst_39 = arith.constant 3.125000e-02 : f32
    %77 = vector.broadcast %cst_39 : f32 to vector<1x128xf32>
    %78 = arith.mulf %73, %77 : vector<1x128xf32>
    %cst_40 = arith.constant 3.125000e-02 : f32
    %79 = vector.broadcast %cst_40 : f32 to vector<1x128xf32>
    %80 = arith.mulf %76, %79 : vector<1x128xf32>
    %81 = arith.mulf %78, %78 : vector<1x128xf32>
    %82 = arith.subf %80, %81 : vector<1x128xf32>
    %cst_41 = arith.constant 0.000000e+00 : f32
    %83 = vector.broadcast %cst_41 : f32 to vector<1x128xf32>
    %84 = arith.maximumf %82, %83 : vector<1x128xf32>
    %85 = vector.broadcast %78 : vector<1x128xf32> to vector<32x128xf32>
    %86 = arith.subf %71, %85 : vector<32x128xf32>
    %cst_42 = arith.constant 9.99999974E-6 : f32
    %87 = vector.broadcast %cst_42 : f32 to vector<1x128xf32>
    %88 = arith.addf %84, %87 : vector<1x128xf32>
    %89 = math.rsqrt %88 : vector<1x128xf32>
    %90 = vector.broadcast %89 : vector<1x128xf32> to vector<32x128xf32>
    %91 = arith.mulf %86, %90 : vector<32x128xf32>
    %c0_43 = arith.constant 0 : index
    %c0_44 = arith.constant 0 : index
    %92 = vector.load %arg12[%c0_43, %c0_44] : memref<32x1xf32, #tpu.memory_space<vmem>>, vector<32x1xf32>
    %93 = vector.broadcast %92 : vector<32x1xf32> to vector<32x128xf32>
    %94 = arith.mulf %91, %93 : vector<32x128xf32>
    %c0_45 = arith.constant 0 : index
    %c0_46 = arith.constant 0 : index
    %95 = vector.load %arg13[%c0_45, %c0_46] : memref<32x1xf32, #tpu.memory_space<vmem>>, vector<32x1xf32>
    %96 = vector.broadcast %95 : vector<32x1xf32> to vector<32x128xf32>
    %97 = arith.addf %94, %96 : vector<32x128xf32>
    %cst_47 = arith.constant 0.000000e+00 : f32
    %98 = vector.broadcast %cst_47 : f32 to vector<32x128xf32>
    %99 = arith.maximumf %97, %98 : vector<32x128xf32>
    %c0_48 = arith.constant 0 : index
    %c0_49 = arith.constant 0 : index
    %100 = vector.load %arg14[%c0_48, %c0_49] : memref<4x32xf32, #tpu.memory_space<vmem>>, vector<4x32xf32>
    %cst_50 = arith.constant dense<0.000000e+00> : vector<4x128xf32>
    %101 = tpu.matmul %100, %99, %cst_50 {dimension_numbers = #tpu.dot_dimension_numbers<[1], [0], [0], [1], [0, 0, 1, 1], [], []>} : vector<4x32xf32>, vector<32x128xf32>, vector<4x128xf32> -> vector<4x128xf32>
    %c0_51 = arith.constant 0 : index
    %c0_52 = arith.constant 0 : index
    %102 = vector.load %arg15[%c0_51, %c0_52] : memref<4x1xf32, #tpu.memory_space<vmem>>, vector<4x1xf32>
    %103 = vector.broadcast %102 : vector<4x1xf32> to vector<4x128xf32>
    %104 = arith.addf %101, %103 : vector<4x128xf32>
    %c0_53 = arith.constant 0 : index
    %c0_54 = arith.constant 0 : index
    %105 = vector.load %arg16[%c0_53, %c0_54] : memref<4x128xf32, #tpu.memory_space<vmem>>, vector<4x128xf32>
    tpu.vector_store %arg16[%c0_53, %c0_54], %104 {strides = array<i32>} : memref<4x128xf32, #tpu.memory_space<vmem>>, vector<4x128xf32>,
    return
  }
  func.func @transform_0(%arg0: i32) -> (i32, i32) {
    %c0_i32 = arith.constant 0 : i32
    %c0_i32_0 = arith.constant 0 : i32
    return %c0_i32, %arg0 : i32, i32
  }
  func.func @transform_1(%arg0: i32) -> (i32, i32) {
    %c0_i32 = arith.constant 0 : i32
    %c0_i32_0 = arith.constant 0 : i32
    %c0_i32_1 = arith.constant 0 : i32
    return %c0_i32, %c0_i32_0 : i32, i32
  }
  func.func @transform_2(%arg0: i32) -> (i32, i32) {
    %c0_i32 = arith.constant 0 : i32
    %c0_i32_0 = arith.constant 0 : i32
    %c0_i32_1 = arith.constant 0 : i32
    return %c0_i32, %c0_i32_0 : i32, i32
  }
  func.func @transform_3(%arg0: i32) -> (i32, i32) {
    %c0_i32 = arith.constant 0 : i32
    %c0_i32_0 = arith.constant 0 : i32
    %c0_i32_1 = arith.constant 0 : i32
    return %c0_i32, %c0_i32_0 : i32, i32
  }
  func.func @transform_4(%arg0: i32) -> (i32, i32) {
    %c0_i32 = arith.constant 0 : i32
    %c0_i32_0 = arith.constant 0 : i32
    %c0_i32_1 = arith.constant 0 : i32
    return %c0_i32, %c0_i32_0 : i32, i32
  }
  func.func @transform_5(%arg0: i32) -> (i32, i32) {
    %c0_i32 = arith.constant 0 : i32
    %c0_i32_0 = arith.constant 0 : i32
    %c0_i32_1 = arith.constant 0 : i32
    return %c0_i32, %c0_i32_0 : i32, i32
  }
  func.func @transform_6(%arg0: i32) -> (i32, i32) {
    %c0_i32 = arith.constant 0 : i32
    %c0_i32_0 = arith.constant 0 : i32
    %c0_i32_1 = arith.constant 0 : i32
    return %c0_i32, %c0_i32_0 : i32, i32
  }
  func.func @transform_7(%arg0: i32) -> (i32, i32) {
    %c0_i32 = arith.constant 0 : i32
    %c0_i32_0 = arith.constant 0 : i32
    %c0_i32_1 = arith.constant 0 : i32
    return %c0_i32, %c0_i32_0 : i32, i32
  }
  func.func @transform_8(%arg0: i32) -> (i32, i32) {
    %c0_i32 = arith.constant 0 : i32
    %c0_i32_0 = arith.constant 0 : i32
    %c0_i32_1 = arith.constant 0 : i32
    return %c0_i32, %c0_i32_0 : i32, i32
  }
  func.func @transform_9(%arg0: i32) -> (i32, i32) {
    %c0_i32 = arith.constant 0 : i32
    %c0_i32_0 = arith.constant 0 : i32
    %c0_i32_1 = arith.constant 0 : i32
    return %c0_i32, %c0_i32_0 : i32, i32
  }
  func.func @transform_10(%arg0: i32) -> (i32, i32) {
    %c0_i32 = arith.constant 0 : i32
    %c0_i32_0 = arith.constant 0 : i32
    %c0_i32_1 = arith.constant 0 : i32
    return %c0_i32, %c0_i32_0 : i32, i32
  }
  func.func @transform_11(%arg0: i32) -> (i32, i32) {
    %c0_i32 = arith.constant 0 : i32
    %c0_i32_0 = arith.constant 0 : i32
    %c0_i32_1 = arith.constant 0 : i32
    return %c0_i32, %c0_i32_0 : i32, i32
  }
  func.func @transform_12(%arg0: i32) -> (i32, i32) {
    %c0_i32 = arith.constant 0 : i32
    %c0_i32_0 = arith.constant 0 : i32
    %c0_i32_1 = arith.constant 0 : i32
    return %c0_i32, %c0_i32_0 : i32, i32
  }
  func.func @transform_13(%arg0: i32) -> (i32, i32) {
    %c0_i32 = arith.constant 0 : i32
    %c0_i32_0 = arith.constant 0 : i32
    %c0_i32_1 = arith.constant 0 : i32
    return %c0_i32, %c0_i32_0 : i32, i32
  }
  func.func @transform_14(%arg0: i32) -> (i32, i32) {
    %c0_i32 = arith.constant 0 : i32
    %c0_i32_0 = arith.constant 0 : i32
    %c0_i32_1 = arith.constant 0 : i32
    return %c0_i32, %c0_i32_0 : i32, i32
  }
  func.func @transform_15(%arg0: i32) -> (i32, i32) {
    %c0_i32 = arith.constant 0 : i32
    %c0_i32_0 = arith.constant 0 : i32
    return %c0_i32, %arg0 : i32, i32
  }
}

</mosaic_0001>

<bundles_post_ra>
// kernel: tpu_custom_call.1
= control target key start
LH: loop header
LB: loop body
LE: loop exit
PB: predicated region body
PF: predicated region fallthrough
CT: control target
= control target key end

     0   :  { %vm144_vm0 = vcmask 31744   ;;  %s2100_s0 = inlined_call_operand.vmem [shape: f32[32,4], index: 0, kind: input, shape index: {}]   ;;  %s2101_s1 = inlined_call_operand.vmem [shape: f32[1024,4], index: 1, kind: input, shape index: {}]   ;;  %s2102_s2 = inlined_call_operand.hbm [shape: f32[32,1024], index: 2, kind: output, shape index: {}]  }
   0x1   :  { %v32_v0 = vld [vmem:[%s2101_s1 + $0x80] sm:$0xff]  ;;  %v33_v1 = vld [vmem:[%s2101_s1 + $0x88] sm:$0xff]  ;;  %vm1497_vm1 = vmpackc.low %vm144_vm0, %vm144_vm0 }
   0x2   :  { %v64_v2 = vld [vmem:[%s2101_s1 + $0x180] sm:$0xff]  ;;  %v1249_v3 = vpack.c.bf16 %v33_v1, %v32_v0  ;;  %v65_v5 = vld [vmem:[%s2101_s1 + $0x188] sm:$0xff]  ;;  %v34_v13 = vld [vmem:[%s2101_s1 + $0x90] sm:$0xff] }
   0x3   :  { %v16_v6 = vld [vmem:[%s2101_s1] sm:$0xff]  ;;  %v1297_v7 = vpack.c.bf16 %v65_v5, %v64_v2  ;;  %v17_v8 = vld [vmem:[%s2101_s1 + $0x8] sm:$0xff]  ;;  %v35_v14 = vld [vmem:[%s2101_s1 + $0x98] sm:$0xff] }
   0x4   :  { %v48_v9 = vld [vmem:[%s2101_s1 + $0x100] sm:$0xff]  ;;  %v49_v10 = vld [vmem:[%s2101_s1 + $0x108] sm:$0xff]  ;;  %1251 = vmatprep.subr.msk.bf16.mxu0 %vm1497_vm1, %v1249_v3  ;;  %v1252_v11 = vpack.c.bf16 %v17_v8, %v16_v6  ;;  %v66_v15 = vld [vmem:[%s2101_s1 + $0x190] sm:$0xff]  ;;  %v1255_v16 = vpack.c.bf16 %v35_v14, %v34_v13 }
   0x5   :  { %v1300_v12 = vpack.c.bf16 %v49_v10, %v48_v9  ;;  %1299 = vmatprep.subr.msk.bf16.mxu1 %vm1497_vm1, %v1297_v7  ;;  %v67_v17 = vld [vmem:[%s2101_s1 + $0x198] sm:$0xff]  ;;  %v18_v19 = vld [vmem:[%s2101_s1 + $0x10] sm:$0xff]  ;;  %v36_v23 = vld [vmem:[%s2101_s1 + $0xa0] sm:$0xff] }
   0x6   :  { %1254 = vmatpush3.bf16.xpose.msk.msra.mxu0 %vm1497_vm1, %v1252_v11  ;;  %v1303_v18 = vpack.c.bf16 %v67_v17, %v66_v15  ;;  %v19_v20 = vld [vmem:[%s2101_s1 + $0x18] sm:$0xff]  ;;  %v50_v21 = vld [vmem:[%s2101_s1 + $0x110] sm:$0xff]  ;;  %v37_v24 = vld [vmem:[%s2101_s1 + $0xa8] sm:$0xff] }
   0x7   :  { %1302 = vmatpush3.bf16.xpose.msk.msra.mxu1 %vm1497_vm1, %v1300_v12  ;;  %1257 = vmatprep.subr.msk.bf16.mxu0 %vm1497_vm1, %v1255_v16  ;;  %v51_v22 = vld [vmem:[%s2101_s1 + $0x118] sm:$0xff]  ;;  %v68_v25 = vld [vmem:[%s2101_s1 + $0x1a0] sm:$0xff]  ;;  %v69_v26 = vld [vmem:[%s2101_s1 + $0x1a8] sm:$0xff]  ;;  %v1258_v27 = vpack.c.bf16 %v19_v20, %v18_v19  ;;  %v1261_v29 = vpack.c.bf16 %v37_v24, %v36_v23 }
   0x8   :  { %1305 = vmatprep.subr.msk.bf16.mxu1 %vm1497_vm1, %v1303_v18  ;;  %v1306_v28 = vpack.c.bf16 %v51_v22, %v50_v21  ;;  %v1309_v30 = vpack.c.bf16 %v69_v26, %v68_v25  ;;  %v20_v31 = vld [vmem:[%s2101_s1 + $0x20] sm:$0xff]  ;;  %v21_v32 = vld [vmem:[%s2101_s1 + $0x28] sm:$0xff]  ;;  %v38_v35 = vld [vmem:[%s2101_s1 + $0xb0] sm:$0xff] }
   0x9   :  { %v52_v33 = vld [vmem:[%s2101_s1 + $0x120] sm:$0xff]  ;;  %v53_v34 = vld [vmem:[%s2101_s1 + $0x128] sm:$0xff]  ;;  %v39_v36 = vld [vmem:[%s2101_s1 + $0xb8] sm:$0xff]  ;;  %v1264_v39 = vpack.c.bf16 %v21_v32, %v20_v31 }
   0xa   :  { %v70_v37 = vld [vmem:[%s2101_s1 + $0x1b0] sm:$0xff]  ;;  %v71_v38 = vld [vmem:[%s2101_s1 + $0x1b8] sm:$0xff]  ;;  %v1312_v40 = vpack.c.bf16 %v53_v34, %v52_v33  ;;  %v1267_v41 = vpack.c.bf16 %v39_v36, %v38_v35  ;;  %v1609_v45 = vld [vmem:[%s2100_s0] sm:$0xff] }
   0xb   :  { %v1315_v42 = vpack.c.bf16 %v71_v38, %v70_v37  ;;  %v22_v43 = vld [vmem:[%s2101_s1 + $0x30] sm:$0xff]  ;;  %v23_v44 = vld [vmem:[%s2101_s1 + $0x38] sm:$0xff]  ;;  %v40_v48 = vld [vmem:[%s2101_s1 + $0xc0] sm:$0xff]  ;;  %1121 = vmatprep.mubr.msk.f32.mxu0 %vm144_vm0, %v1609_v45  ;;  %1161 = vmatprep.mubr.msk.f32.mxu1 %vm144_vm0, %v1609_v45 }
   0xc   :  { %v54_v46 = vld [vmem:[%s2101_s1 + $0x130] sm:$0xff]  ;;  %v55_v47 = vld [vmem:[%s2101_s1 + $0x138] sm:$0xff]  ;;  %v41_v49 = vld [vmem:[%s2101_s1 + $0xc8] sm:$0xff]  ;;  %v1270_v52 = vpack.c.bf16 %v23_v44, %v22_v43 }
   0xd   :  { %v72_v50 = vld [vmem:[%s2101_s1 + $0x1c0] sm:$0xff]  ;;  %v73_v51 = vld [vmem:[%s2101_s1 + $0x1c8] sm:$0xff]  ;;  %v1318_v53 = vpack.c.bf16 %v55_v47, %v54_v46  ;;  %v1273_v54 = vpack.c.bf16 %v41_v49, %v40_v48  ;;  %v42_v60 = vld [vmem:[%s2101_s1 + $0xd0] sm:$0xff] }
   0xe   :  { %1260 = vmatpush3.bf16.xpose.msk.msra.mxu0 %vm1497_vm1, %v1258_v27  ;;  %v1321_v55 = vpack.c.bf16 %v73_v51, %v72_v50  ;;  %v24_v56 = vld [vmem:[%s2101_s1 + $0x40] sm:$0xff]  ;;  %v25_v57 = vld [vmem:[%s2101_s1 + $0x48] sm:$0xff]  ;;  %v43_v61 = vld [vmem:[%s2101_s1 + $0xd8] sm:$0xff] }
   0xf   :  { %1308 = vmatpush3.bf16.xpose.msk.msra.mxu1 %vm1497_vm1, %v1306_v28  ;;  %1263 = vmatprep.subr.msk.bf16.mxu0 %vm1497_vm1, %v1261_v29  ;;  %v56_v58 = vld [vmem:[%s2101_s1 + $0x140] sm:$0xff]  ;;  %v57_v59 = vld [vmem:[%s2101_s1 + $0x148] sm:$0xff]  ;;  %v74_v62 = vld [vmem:[%s2101_s1 + $0x1d0] sm:$0xff]  ;;  %v1276_v0 = vpack.c.bf16 %v25_v57, %v24_v56  ;;  %v1279_v2 = vpack.c.bf16 %v43_v61, %v42_v60 }
  0x10   :  { %1311 = vmatprep.subr.msk.bf16.mxu1 %vm1497_vm1, %v1309_v30  ;;  %v75_v63 = vld [vmem:[%s2101_s1 + $0x1d8] sm:$0xff]  ;;  %v1324_v1 = vpack.c.bf16 %v57_v59, %v56_v58  ;;  %v26_v5 = vld [vmem:[%s2101_s1 + $0x50] sm:$0xff]  ;;  %v44_v9 = vld [vmem:[%s2101_s1 + $0xe0] sm:$0xff] }
  0x11   :  { %v1327_v3 = vpack.c.bf16 %v75_v63, %v74_v62  ;;  %v27_v6 = vld [vmem:[%s2101_s1 + $0x58] sm:$0xff]  ;;  %v58_v7 = vld [vmem:[%s2101_s1 + $0x150] sm:$0xff]  ;;  %v45_v10 = vld [vmem:[%s2101_s1 + $0xe8] sm:$0xff] }
  0x12   :  { %v59_v8 = vld [vmem:[%s2101_s1 + $0x158] sm:$0xff]  ;;  %v76_v11 = vld [vmem:[%s2101_s1 + $0x1e0] sm:$0xff]  ;;  %v77_v12 = vld [vmem:[%s2101_s1 + $0x1e8] sm:$0xff]  ;;  %v1282_v13 = vpack.c.bf16 %v27_v6, %v26_v5  ;;  %v1285_v15 = vpack.c.bf16 %v45_v10, %v44_v9 }
  0x13   :  { %v1330_v14 = vpack.c.bf16 %v59_v8, %v58_v7  ;;  %v1333_v16 = vpack.c.bf16 %v77_v12, %v76_v11 }
  0x16   :  { %1266 = vmatpush3.bf16.xpose.msk.msra.mxu0 %vm1497_vm1, %v1264_v39 }
  0x17   :  { %1314 = vmatpush3.bf16.xpose.msk.msra.mxu1 %vm1497_vm1, %v1312_v40  ;;  %1269 = vmatprep.subr.msk.bf16.mxu0 %vm1497_vm1, %v1267_v41 }
  0x18   :  { %1317 = vmatprep.subr.msk.bf16.mxu1 %vm1497_vm1, %v1315_v42 }
  0x1e   :  { %1272 = vmatpush3.bf16.xpose.msk.msra.mxu0 %vm1497_vm1, %v1270_v52 }
  0x1f   :  { %1320 = vmatpush3.bf16.xpose.msk.msra.mxu1 %vm1497_vm1, %v1318_v53  ;;  %1275 = vmatprep.subr.msk.bf16.mxu0 %vm1497_vm1, %v1273_v54 }
  0x20   :  { %1323 = vmatprep.subr.msk.bf16.mxu1 %vm1497_vm1, %v1321_v55 }
  0x26   :  { %1278 = vmatpush3.bf16.xpose.msk.msra.mxu0 %vm1497_vm1, %v1276_v0 }
  0x27   :  { %1326 = vmatpush3.bf16.xpose.msk.msra.mxu1 %vm1497_vm1, %v1324_v1  ;;  %1281 = vmatprep.subr.msk.bf16.mxu0 %vm1497_vm1, %v1279_v2 }
  0x28   :  { %1329 = vmatprep.subr.msk.bf16.mxu1 %vm1497_vm1, %v1327_v3 }
  0x29   :  { %7 = vsyncpa [#allocation3], 0  ;;  %v28_v17 = vld [vmem:[%s2101_s1 + $0x60] sm:$0xff]  ;;  %v29_v18 = vld [vmem:[%s2101_s1 + $0x68] sm:$0xff] }
  0x2a   :  { %v60_v19 = vld [vmem:[%s2101_s1 + $0x160] sm:$0xff]  ;;  %v61_v20 = vld [vmem:[%s2101_s1 + $0x168] sm:$0xff]  ;;  %v46_v21 = vld [vmem:[%s2101_s1 + $0xf0] sm:$0xff]  ;;  %v1288_v25 = vpack.c.bf16 %v29_v18, %v28_v17 }
  0x2b   :  { %v47_v22 = vld [vmem:[%s2101_s1 + $0xf8] sm:$0xff]  ;;  %v78_v23 = vld [vmem:[%s2101_s1 + $0x1f0] sm:$0xff]  ;;  %v1336_v26 = vpack.c.bf16 %v61_v20, %v60_v19  ;;  %v96_v33 = vld [vmem:[%s2101_s1 + $0x280] sm:$0xff] }
  0x2c   :  { %v79_v24 = vld [vmem:[%s2101_s1 + $0x1f8] sm:$0xff]  ;;  %v1291_v27 = vpack.c.bf16 %v47_v22, %v46_v21  ;;  %v30_v29 = vld [vmem:[%s2101_s1 + $0x70] sm:$0xff]  ;;  %v97_v34 = vld [vmem:[%s2101_s1 + $0x288] sm:$0xff] }
  0x2d   :  { %v1339_v28 = vpack.c.bf16 %v79_v24, %v78_v23  ;;  %v31_v30 = vld [vmem:[%s2101_s1 + $0x78] sm:$0xff]  ;;  %v62_v31 = vld [vmem:[%s2101_s1 + $0x170] sm:$0xff]  ;;  %v128_v35 = vld [vmem:[%s2101_s1 + $0x380] sm:$0xff]  ;;  %v1345_v39 = vpack.c.bf16 %v97_v34, %v96_v33 }
  0x2e   :  { %1284 = vmatpush3.bf16.xpose.msk.msra.mxu0 %vm1497_vm1, %v1282_v13  ;;  %v63_v32 = vld [vmem:[%s2101_s1 + $0x178] sm:$0xff]  ;;  %v129_v36 = vld [vmem:[%s2101_s1 + $0x388] sm:$0xff]  ;;  %v1294_v37 = vpack.c.bf16 %v31_v30, %v30_v29  ;;  %v80_v41 = vld [vmem:[%s2101_s1 + $0x200] sm:$0xff] }
  0x2f   :  { %1332 = vmatpush3.bf16.xpose.msk.msra.mxu1 %vm1497_vm1, %v1330_v14  ;;  %1287 = vmatprep.subr.msk.bf16.mxu0 %vm1497_vm1, %v1285_v15  ;;  %v1342_v38 = vpack.c.bf16 %v63_v32, %v62_v31  ;;  %v1393_v40 = vpack.c.bf16 %v129_v36, %v128_v35  ;;  %v81_v42 = vld [vmem:[%s2101_s1 + $0x208] sm:$0xff]  ;;  %v112_v43 = vld [vmem:[%s2101_s1 + $0x300] sm:$0xff]  ;;  %v98_v46 = vld [vmem:[%s2101_s1 + $0x290] sm:$0xff] }
  0x30   :  { %1335 = vmatprep.subr.msk.bf16.mxu1 %vm1497_vm1, %v1333_v16  ;;  %v113_v44 = vld [vmem:[%s2101_s1 + $0x308] sm:$0xff]  ;;  %v99_v47 = vld [vmem:[%s2101_s1 + $0x298] sm:$0xff]  ;;  %v130_v48 = vld [vmem:[%s2101_s1 + $0x390] sm:$0xff]  ;;  %v1348_v50 = vpack.c.bf16 %v81_v42, %v80_v41 }
  0x31   :  { %v131_v49 = vld [vmem:[%s2101_s1 + $0x398] sm:$0xff]  ;;  %v1396_v51 = vpack.c.bf16 %v113_v44, %v112_v43  ;;  %v1351_v52 = vpack.c.bf16 %v99_v47, %v98_v46  ;;  %v1804_v54 = vld [vmem:[%s2100_s0 + $0x8] sm:$0xff]  ;;  %v82_v55 = vld [vmem:[%s2101_s1 + $0x210] sm:$0xff] }
  0x32   :  { %v1399_v53 = vpack.c.bf16 %v131_v49, %v130_v48  ;;  %v83_v56 = vld [vmem:[%s2101_s1 + $0x218] sm:$0xff]  ;;  %v114_v57 = vld [vmem:[%s2101_s1 + $0x310] sm:$0xff]  ;;  %v100_v59 = vld [vmem:[%s2101_s1 + $0x2a0] sm:$0xff] }
  0x33   :  { %v115_v58 = vld [vmem:[%s2101_s1 + $0x318] sm:$0xff]  ;;  %v1832_v60 = vld [vmem:[%s2100_s0 + $0x10] sm:$0xff]  ;;  %v101_v61 = vld [vmem:[%s2101_s1 + $0x2a8] sm:$0xff]  ;;  %v1354_v0 = vpack.c.bf16 %v83_v56, %v82_v55 }
  0x34   :  { %v132_v62 = vld [vmem:[%s2101_s1 + $0x3a0] sm:$0xff]  ;;  %v133_v63 = vld [vmem:[%s2101_s1 + $0x3a8] sm:$0xff]  ;;  %v1402_v1 = vpack.c.bf16 %v115_v58, %v114_v57  ;;  %v1357_v2 = vpack.c.bf16 %v101_v61, %v100_v59  ;;  %v1862_v5 = vld [vmem:[%s2100_s0 + $0x18] sm:$0xff] }
  0x35   :  { %v1405_v3 = vpack.c.bf16 %v133_v63, %v132_v62  ;;  %v84_v6 = vld [vmem:[%s2101_s1 + $0x220] sm:$0xff]  ;;  %v85_v7 = vld [vmem:[%s2101_s1 + $0x228] sm:$0xff]  ;;  %v102_v10 = vld [vmem:[%s2101_s1 + $0x2b0] sm:$0xff] }
  0x36   :  { %1290 = vmatpush3.bf16.xpose.msk.msra.mxu0 %vm1497_vm1, %v1288_v25  ;;  %v116_v8 = vld [vmem:[%s2101_s1 + $0x320] sm:$0xff]  ;;  %v117_v9 = vld [vmem:[%s2101_s1 + $0x328] sm:$0xff]  ;;  %v103_v11 = vld [vmem:[%s2101_s1 + $0x2b8] sm:$0xff]  ;;  %v1360_v14 = vpack.c.bf16 %v85_v7, %v84_v6 }
  0x37   :  { %1338 = vmatpush3.bf16.xpose.msk.msra.mxu1 %vm1497_vm1, %v1336_v26  ;;  %1293 = vmatprep.subr.msk.bf16.mxu0 %vm1497_vm1, %v1291_v27  ;;  %v134_v12 = vld [vmem:[%s2101_s1 + $0x3b0] sm:$0xff]  ;;  %v135_v13 = vld [vmem:[%s2101_s1 + $0x3b8] sm:$0xff]  ;;  %v1408_v15 = vpack.c.bf16 %v117_v9, %v116_v8  ;;  %v1363_v16 = vpack.c.bf16 %v103_v11, %v102_v10  ;;  %v104_v22 = vld [vmem:[%s2101_s1 + $0x2c0] sm:$0xff] }
  0x38   :  { %1341 = vmatprep.subr.msk.bf16.mxu1 %vm1497_vm1, %v1339_v28  ;;  %v1411_v17 = vpack.c.bf16 %v135_v13, %v134_v12  ;;  %v86_v18 = vld [vmem:[%s2101_s1 + $0x230] sm:$0xff]  ;;  %v87_v19 = vld [vmem:[%s2101_s1 + $0x238] sm:$0xff]  ;;  %v105_v23 = vld [vmem:[%s2101_s1 + $0x2c8] sm:$0xff] }
  0x39   :  { %v118_v20 = vld [vmem:[%s2101_s1 + $0x330] sm:$0xff]  ;;  %v119_v21 = vld [vmem:[%s2101_s1 + $0x338] sm:$0xff]  ;;  %v136_v24 = vld [vmem:[%s2101_s1 + $0x3c0] sm:$0xff]  ;;  %v1366_v26 = vpack.c.bf16 %v87_v19, %v86_v18  ;;  %v1369_v28 = vpack.c.bf16 %v105_v23, %v104_v22 }
  0x3a   :  { %v137_v25 = vld [vmem:[%s2101_s1 + $0x3c8] sm:$0xff]  ;;  %v1414_v27 = vpack.c.bf16 %v119_v21, %v118_v20  ;;  %v88_v30 = vld [vmem:[%s2101_s1 + $0x240] sm:$0xff]  ;;  %v106_v34 = vld [vmem:[%s2101_s1 + $0x2d0] sm:$0xff] }
  0x3b   :  { %v1417_v29 = vpack.c.bf16 %v137_v25, %v136_v24  ;;  %v89_v31 = vld [vmem:[%s2101_s1 + $0x248] sm:$0xff]  ;;  %v120_v32 = vld [vmem:[%s2101_s1 + $0x340] sm:$0xff]  ;;  %v107_v35 = vld [vmem:[%s2101_s1 + $0x2d8] sm:$0xff] }
  0x3c   :  { %v121_v33 = vld [vmem:[%s2101_s1 + $0x348] sm:$0xff]  ;;  %v138_v36 = vld [vmem:[%s2101_s1 + $0x3d0] sm:$0xff]  ;;  %v91_v43 = vld [vmem:[%s2101_s1 + $0x258] sm:$0xff] }
  0x3d   :  { %v90_v42 = vld [vmem:[%s2101_s1 + $0x250] sm:$0xff]  ;;  %v123_v46 = vld [vmem:[%s2101_s1 + $0x358] sm:$0xff]  ;;  %v108_v47 = vld [vmem:[%s2101_s1 + $0x2e0] sm:$0xff] }
  0x3e   :  { %1296 = vmatpush3.bf16.xpose.msk.msra.mxu0 %vm1497_vm1, %v1294_v37  ;;  %v139_v37 = vld [vmem:[%s2101_s1 + $0x3d8] sm:$0xff]  ;;  %v122_v44 = vld [vmem:[%s2101_s1 + $0x350] sm:$0xff]  ;;  %v109_v48 = vld [vmem:[%s2101_s1 + $0x2e8] sm:$0xff] }
  0x3f   :  { %1344 = vmatpush3.bf16.xpose.msk.msra.mxu1 %vm1497_vm1, %v1342_v38  ;;  %1347 = vmatprep.subr.msk.bf16.mxu0 %vm1497_vm1, %v1345_v39  ;;  %v1372_v38 = vpack.c.bf16 %v89_v31, %v88_v30  ;;  %v1420_v39 = vpack.c.bf16 %v121_v33, %v120_v32  ;;  %v1423_v41 = vpack.c.bf16 %v139_v37, %v138_v36  ;;  %v140_v49 = vld [vmem:[%s2101_s1 + $0x3e0] sm:$0xff]  ;;  %v93_v57 = vld [vmem:[%s2101_s1 + $0x268] sm:$0xff]  ;;  %v110_v61 = vld [vmem:[%s2101_s1 + $0x2f0] sm:$0xff] }
  0x40   :  { %1395 = vmatprep.subr.msk.bf16.mxu1 %vm1497_vm1, %v1393_v40  ;;  %v1375_v40 = vpack.c.bf16 %v107_v35, %v106_v34  ;;  %v92_v56 = vld [vmem:[%s2101_s1 + $0x260] sm:$0xff]  ;;  %v125_v59 = vld [vmem:[%s2101_s1 + $0x368] sm:$0xff]  ;;  %v111_v62 = vld [vmem:[%s2101_s1 + $0x2f8] sm:$0xff] }
  0x41   :  { %v124_v58 = vld [vmem:[%s2101_s1 + $0x360] sm:$0xff]  ;;  %v142_v63 = vld [vmem:[%s2101_s1 + $0x3f0] sm:$0xff]  ;;  %v95_v8 = vld [vmem:[%s2101_s1 + $0x278] sm:$0xff] }
  0x42   :  { %v94_v7 = vld [vmem:[%s2101_s1 + $0x270] sm:$0xff]  ;;  %v127_v10 = vld [vmem:[%s2101_s1 + $0x378] sm:$0xff] }
  0x43   :  { %v126_v9 = vld [vmem:[%s2101_s1 + $0x370] sm:$0xff]  ;;  %v1390_v11 = vpack.c.bf16 %v95_v8, %v94_v7 }
  0x44   :  { %v1438_v12 = vpack.c.bf16 %v127_v10, %v126_v9 }
  0x45   :  { %1122 = vmatmul.mubr.msk.f32.vlgmr.msra.gmra.mrb[0].mxu0 %vm144_vm0, %v1609_v45 }
  0x46   :  { %1162 = vmatmul.mubr.msk.f32.vlgmr.msra.gmra.mrb[0].mxu1 %vm144_vm0, %v1609_v45  ;;  %1350 = vmatpush3.bf16.xpose.msk.msra.mxu0 %vm1497_vm1, %v1348_v50  ;;  %v141_v50 = vld [vmem:[%s2101_s1 + $0x3e8] sm:$0xff] }
  0x47   :  { %1398 = vmatpush3.bf16.xpose.msk.msra.mxu1 %vm1497_vm1, %v1396_v51  ;;  %1353 = vmatprep.subr.msk.bf16.mxu0 %vm1497_vm1, %v1351_v52  ;;  %v1378_v51 = vpack.c.bf16 %v91_v43, %v90_v42  ;;  %v1426_v52 = vpack.c.bf16 %v123_v46, %v122_v44  ;;  %v1429_v55 = vpack.c.bf16 %v141_v50, %v140_v49 }
  0x48   :  { %1401 = vmatprep.subr.msk.bf16.mxu1 %vm1497_vm1, %v1399_v53  ;;  %1123 = vmatprep.mubr.msk.f32.mxu0 %vm144_vm0, %v1804_v54  ;;  %v1381_v53 = vpack.c.bf16 %v109_v48, %v108_v47 }
  0x49   :  { %1163 = vmatprep.mubr.msk.f32.mxu1 %vm144_vm0, %v1804_v54  ;;  %1124 = vmatmul.mubr.msk.f32.gmra.mrb[2].mxu0 %vm144_vm0, %v1804_v54 }
  0x4a   :  { %1164 = vmatmul.mubr.msk.f32.gmra.mrb[2].mxu1 %vm144_vm0, %v1804_v54  ;;  %1125 = vmatprep.mubr.msk.f32.mxu0 %vm144_vm0, %v1832_v60 }
  0x4b   :  { %1165 = vmatprep.mubr.msk.f32.mxu1 %vm144_vm0, %v1832_v60 }
  0x4d   :  { %1126 = vmatmul.mubr.msk.f32.gmra.mrb[4].mxu0 %vm144_vm0, %v1832_v60 }
  0x4e   :  { %1166 = vmatmul.mubr.msk.f32.gmra.mrb[4].mxu1 %vm144_vm0, %v1832_v60  ;;  %1356 = vmatpush3.bf16.xpose.msk.msra.mxu0 %vm1497_vm1, %v1354_v0  ;;  %v143_v0 = vld [vmem:[%s2101_s1 + $0x3f8] sm:$0xff]  ;;  %s1468_s1 = smov [#allocation2]  }
  0x4f   :  { %1404 = vmatpush3.bf16.xpose.msk.msra.mxu1 %vm1497_vm1, %v1402_v1  ;;  %1359 = vmatprep.subr.msk.bf16.mxu0 %vm1497_vm1, %v1357_v2  ;;  %v1384_v1 = vpack.c.bf16 %v93_v57, %v92_v56  ;;  %v1432_v2 = vpack.c.bf16 %v125_v59, %v124_v58  ;;  %v1435_v6 = vpack.c.bf16 %v143_v0, %v142_v63  ;;  %s934_s18 = sshll.u32 %s1468_s1, 4  ;;  %s935_s18 = int_to_ptr.vmem [resolvable:$true] %s934_s18 }
  0x50   :  { %1407 = vmatprep.subr.msk.bf16.mxu1 %vm1497_vm1, %v1405_v3  ;;  %1127 = vmatprep.mubr.msk.f32.mxu0 %vm144_vm0, %v1862_v5  ;;  %v1387_v3 = vpack.c.bf16 %v111_v62, %v110_v61  ;;  %s1444_s19 = scalar_lea.vmem %s935_s18, 4096  ;;  %p1449_p1 = scmp.lt.s32.totalorder %s935_s18, %s935_s18 }
  0x51   :  { %1167 = vmatprep.mubr.msk.f32.mxu1 %vm144_vm0, %v1862_v5  ;;  %1128 = vmatmul.mubr.msk.f32.gmra.mrb[6].mxu0 %vm144_vm0, %v1862_v5  ;;  %p1445_p0 = scmp.ne.s32.totalorder %s935_s18, %s1444_s19  ;;  %p1450_p2 = scmp.lt.s32.totalorder %s1444_s19, %s1444_s19 }
  0x52   :  { %1168 = vmatmul.mubr.msk.f32.gmra.mrb[6].mxu1 %vm144_vm0, %v1862_v5  ;;  %1201 = vmatprep.mubr.msk.f32.mxu0 %vm144_vm0, %v1609_v45 }
  0x53   :  { %1241 = vmatprep.mubr.msk.f32.mxu1 %vm144_vm0, %v1609_v45  ;;  %p1451_p3 = por %p1450_p2, %p1449_p1 }
  0x55   :  { %p1452_p4 = pnand %p1451_p3, %p1445_p0 }
  0x56   :  { %1362 = vmatpush3.bf16.xpose.msk.msra.mxu0 %vm1497_vm1, %v1360_v14 }
  0x57   :  { %1410 = vmatpush3.bf16.xpose.msk.msra.mxu1 %vm1497_vm1, %v1408_v15  ;;  %1365 = vmatprep.subr.msk.bf16.mxu0 %vm1497_vm1, %v1363_v16 }
  0x58   :  { %1413 = vmatprep.subr.msk.bf16.mxu1 %vm1497_vm1, %v1411_v17 }
  0x5e   :  { %1368 = vmatpush3.bf16.xpose.msk.msra.mxu0 %vm1497_vm1, %v1366_v26 }
  0x5f   :  { %1416 = vmatpush3.bf16.xpose.msk.msra.mxu1 %vm1497_vm1, %v1414_v27  ;;  %1371 = vmatprep.subr.msk.bf16.mxu0 %vm1497_vm1, %v1369_v28 }
  0x60   :  { %1419 = vmatprep.subr.msk.bf16.mxu1 %vm1497_vm1, %v1417_v29 }
  0x66   :  { %1374 = vmatpush3.bf16.xpose.msk.msra.mxu0 %vm1497_vm1, %v1372_v38 }
  0x67   :  { %1422 = vmatpush3.bf16.xpose.msk.msra.mxu1 %vm1497_vm1, %v1420_v39  ;;  %1377 = vmatprep.subr.msk.bf16.mxu0 %vm1497_vm1, %v1375_v40 }
  0x68   :  { %1425 = vmatprep.subr.msk.bf16.mxu1 %vm1497_vm1, %v1423_v41 }
  0x6e   :  { %1380 = vmatpush3.bf16.xpose.msk.msra.mxu0 %vm1497_vm1, %v1378_v51 }
  0x6f   :  { %1428 = vmatpush3.bf16.xpose.msk.msra.mxu1 %vm1497_vm1, %v1426_v52  ;;  %1383 = vmatprep.subr.msk.bf16.mxu0 %vm1497_vm1, %v1381_v53 }
  0x70   :  { %1431 = vmatprep.subr.msk.bf16.mxu1 %vm1497_vm1, %v1429_v55 }
  0x76   :  { %1386 = vmatpush3.bf16.xpose.msk.msra.mxu0 %vm1497_vm1, %v1384_v1 }
  0x77   :  { %1434 = vmatpush3.bf16.xpose.msk.msra.mxu1 %vm1497_vm1, %v1432_v2  ;;  %1389 = vmatprep.subr.msk.bf16.mxu0 %vm1497_vm1, %v1387_v3 }
  0x78   :  { %1437 = vmatprep.subr.msk.bf16.mxu1 %vm1497_vm1, %v1435_v6 }
  0x7e   :  { %1392 = vmatpush3.bf16.xpose.msk.msra.mxu0 %vm1497_vm1, %v1390_v11 }
  0x7f   :  { %1440 = vmatpush3.bf16.xpose.msk.msra.mxu1 %vm1497_vm1, %v1438_v12 }
  0x85   :  { %1202 = vmatmul.mubr.msk.f32.vlgmr.msra.gmra.mrb[8].mxu0 %vm144_vm0, %v1609_v45 }
  0x86   :  { %1242 = vmatmul.mubr.msk.f32.vlgmr.msra.gmra.mrb[8].mxu1 %vm144_vm0, %v1609_v45  ;;  %1203 = vmatprep.mubr.msk.f32.mxu0 %vm144_vm0, %v1804_v54 }
  0x87   :  { %1243 = vmatprep.mubr.msk.f32.mxu1 %vm144_vm0, %v1804_v54 }
  0x89   :  { %1204 = vmatmul.mubr.msk.f32.gmra.mrb[10].mxu0 %vm144_vm0, %v1804_v54 }
  0x8a   :  { %1244 = vmatmul.mubr.msk.f32.gmra.mrb[10].mxu1 %vm144_vm0, %v1804_v54  ;;  %1205 = vmatprep.mubr.msk.f32.mxu0 %vm144_vm0, %v1832_v60 }
  0x8b   :  { %1245 = vmatprep.mubr.msk.f32.mxu1 %vm144_vm0, %v1832_v60 }
  0x8d   :  { %1206 = vmatmul.mubr.msk.f32.gmra.mrb[12].mxu0 %vm144_vm0, %v1832_v60 }
  0x8e   :  { %1246 = vmatmul.mubr.msk.f32.gmra.mrb[12].mxu1 %vm144_vm0, %v1832_v60  ;;  %1207 = vmatprep.mubr.msk.f32.mxu0 %vm144_vm0, %v1862_v5 }
  0x8f   :  { %1247 = vmatprep.mubr.msk.f32.mxu1 %vm144_vm0, %v1862_v5 }
  0x91   :  { %1208 = vmatmul.mubr.msk.f32.gmra.mrb[14].mxu0 %vm144_vm0, %v1862_v5 }
  0x92   :  { %1248 = vmatmul.mubr.msk.f32.gmra.mrb[14].mxu1 %vm144_vm0, %v1862_v5 }
 0x118   :  { %v607_v4 = vpop.f32.mrb[0].mxu0 }
 0x119   :  { %v696_v45 = vpop.f32.mrb[0].mxu1  ;;  %897 = vst [vmem:[#allocation2] sm:$0xff] %v607_v4  ;;  %v609_v54 = vpop.f32.mrb[1].mxu0 }
 0x11a   :  { %899 = vst [vmem:[#allocation2 + $0x10] sm:$0xff] %v696_v45  ;;  %v698_v13 = vpop.f32.mrb[1].mxu1  ;;  %898 = vst [vmem:[#allocation2 + $0x8] sm:$0xff] %v609_v54 }
 0x11b   :  { %900 = vst [vmem:[#allocation2 + $0x18] sm:$0xff] %v698_v13 }
 0x11c   :  { %v613_v60 = vpop.f32.mrb[2].mxu0 }
 0x11d   :  { %v702_v14 = vpop.f32.mrb[2].mxu1  ;;  %905 = vst [vmem:[#allocation2 + $0x40] sm:$0xff] %v613_v60  ;;  %v615_v15 = vpop.f32.mrb[3].mxu0 }
 0x11e   :  { %907 = vst [vmem:[#allocation2 + $0x50] sm:$0xff] %v702_v14  ;;  %v704_v16 = vpop.f32.mrb[3].mxu1  ;;  %906 = vst [vmem:[#allocation2 + $0x48] sm:$0xff] %v615_v15 }
 0x11f   :  { %908 = vst [vmem:[#allocation2 + $0x58] sm:$0xff] %v704_v16 }
 0x120   :  { %v619_v17 = vpop.f32.mrb[4].mxu0 }
 0x121   :  { %v708_v18 = vpop.f32.mrb[4].mxu1  ;;  %913 = vst [vmem:[#allocation2 + $0x80] sm:$0xff] %v619_v17  ;;  %v621_v5 = vpop.f32.mrb[5].mxu0 }
 0x122   :  { %915 = vst [vmem:[#allocation2 + $0x90] sm:$0xff] %v708_v18  ;;  %v710_v19 = vpop.f32.mrb[5].mxu1  ;;  %914 = vst [vmem:[#allocation2 + $0x88] sm:$0xff] %v621_v5 }
 0x123   :  { %916 = vst [vmem:[#allocation2 + $0x98] sm:$0xff] %v710_v19 }
 0x124   :  { %v625_v20 = vpop.f32.mrb[6].mxu0 }
 0x125   :  { %v714_v21 = vpop.f32.mrb[6].mxu1  ;;  %921 = vst [vmem:[#allocation2 + $0xc0] sm:$0xff] %v625_v20  ;;  %v627_v22 = vpop.f32.mrb[7].mxu0 }
 0x126   :  { %923 = vst [vmem:[#allocation2 + $0xd0] sm:$0xff] %v714_v21  ;;  %v716_v23 = vpop.f32.mrb[7].mxu1  ;;  %922 = vst [vmem:[#allocation2 + $0xc8] sm:$0xff] %v627_v22 }
 0x127   :  { %924 = vst [vmem:[#allocation2 + $0xd8] sm:$0xff] %v716_v23 }
 0x158   :  { %v785_v24 = vpop.f32.mrb[8].mxu0 }
 0x159   :  { %v874_v25 = vpop.f32.mrb[8].mxu1  ;;  %901 = vst [vmem:[#allocation2 + $0x20] sm:$0xff] %v785_v24  ;;  %v787_v26 = vpop.f32.mrb[9].mxu0 }
 0x15a   :  { %903 = vst [vmem:[#allocation2 + $0x30] sm:$0xff] %v874_v25  ;;  %v876_v27 = vpop.f32.mrb[9].mxu1  ;;  %902 = vst [vmem:[#allocation2 + $0x28] sm:$0xff] %v787_v26 }
 0x15b   :  { %904 = vst [vmem:[#allocation2 + $0x38] sm:$0xff] %v876_v27 }
 0x15c   :  { %v791_v28 = vpop.f32.mrb[10].mxu0 }
 0x15d   :  { %v880_v29 = vpop.f32.mrb[10].mxu1  ;;  %909 = vst [vmem:[#allocation2 + $0x60] sm:$0xff] %v791_v28  ;;  %v793_v30 = vpop.f32.mrb[11].mxu0 }
 0x15e   :  { %911 = vst [vmem:[#allocation2 + $0x70] sm:$0xff] %v880_v29  ;;  %v882_v31 = vpop.f32.mrb[11].mxu1  ;;  %910 = vst [vmem:[#allocation2 + $0x68] sm:$0xff] %v793_v30 }
 0x15f   :  { %912 = vst [vmem:[#allocation2 + $0x78] sm:$0xff] %v882_v31 }
 0x160   :  { %v797_v32 = vpop.f32.mrb[12].mxu0 }
 0x161   :  { %v886_v33 = vpop.f32.mrb[12].mxu1  ;;  %917 = vst [vmem:[#allocation2 + $0xa0] sm:$0xff] %v797_v32  ;;  %v799_v34 = vpop.f32.mrb[13].mxu0 }
 0x162   :  { %919 = vst [vmem:[#allocation2 + $0xb0] sm:$0xff] %v886_v33  ;;  %v888_v35 = vpop.f32.mrb[13].mxu1  ;;  %918 = vst [vmem:[#allocation2 + $0xa8] sm:$0xff] %v799_v34 }
 0x163   :  { %920 = vst [vmem:[#allocation2 + $0xb8] sm:$0xff] %v888_v35 }
 0x164   :  { %v803_v36 = vpop.f32.mrb[14].mxu0 }
 0x165   :  { %v892_v37 = vpop.f32.mrb[14].mxu1  ;;  %925 = vst [vmem:[#allocation2 + $0xe0] sm:$0xff] %v803_v36  ;;  %v805_v38 = vpop.f32.mrb[15].mxu0 }
 0x166   :  { %927 = vst [vmem:[#allocation2 + $0xf0] sm:$0xff] %v892_v37  ;;  %v894_v39 = vpop.f32.mrb[15].mxu1  ;;  %926 = vst [vmem:[#allocation2 + $0xe8] sm:$0xff] %v805_v38 }
 0x167   :  { %928 = vst [vmem:[#allocation2 + $0xf8] sm:$0xff] %v894_v39 }
 0x168   :  { %1455 = shalt.err (!%p1452_p4)
}
 0x169   :  { %s1456_s21 = scalar_lea.hbm %s2102_s2, 4096 }
 0x16a   :  { %p1457_p5 = scmp.ne.s32.totalorder %s2102_s2, %s1456_s21  ;;  %p1460_p6 = scmp.lt.u32.totalorder %s1456_s21, %s2102_s2 }
 0x16c   :  { %p1462_p7 = pnand %p1460_p6, %p1457_p5 }
 0x16e   :  { %1465 = shalt.err (!%p1462_p7)
}
 0x16f   :  { %s1469_s26 = smov 1024   ;;  %s1470_s27 = smov 64  }
 0x170   :  { %940 = dma.vmem_to_hbm [thread:$0]  %s935_s18, 4096, %s2102_s2, [#allocation3], %s1469_s26, %s1469_s26, %s1470_s27  }
 0x171   :  { %1466 = dma.done.wait [#allocation3], 4096  }
 0x172   :  { %1467 = vsyncadd [#allocation3], 4294963200 }
 0x173   :  { %944 = vsyncpa [#allocation3], 1 }

// kernel: tpu_custom_call.1
= control target key start
LH: loop header
LB: loop body
LE: loop exit
PB: predicated region body
PF: predicated region fallthrough
CT: control target
= control target key end

     0   :  { %20 = vsyncpa [#allocation3], 0  ;;  %s1901_s0 = inlined_call_operand.vmem [shape: f32[4,400], index: 0, kind: input, shape index: {}]   ;;  %s1902_s1 = inlined_call_operand.vmem [shape: f32[32,4], index: 1, kind: input, shape index: {}]   ;;  %s1903_s2 = inlined_call_operand.vmem [shape: f32[32,1], index: 2, kind: input, shape index: {}]   ;;  %s1904_s3 = inlined_call_operand.vmem [shape: f32[32,1], index: 3, kind: input, shape index: {}]   ;;  %s1905_s4 = inlined_call_operand.vmem [shape: f32[32,1], index: 4, kind: input, shape index: {}]   ;;  %s1906_s5 = inlined_call_operand.vmem [shape: f32[32,32], index: 5, kind: input, shape index: {}]   ;;  %s1907_s6 = inlined_call_operand.vmem [shape: f32[32,1], index: 6, kind: input, shape index: {}]   ;;  %s1908_s7 = inlined_call_operand.vmem [shape: f32[32,1], index: 7, kind: input, shape index: {}]   ;;  %s1909_s8 = inlined_call_operand.vmem [shape: f32[32,1], index: 8, kind: input, shape index: {}]   ;;  %s1910_s9 = inlined_call_operand.vmem [shape: f32[32,32], index: 9, kind: input, shape index: {}]   ;;  %s1911_s10 = inlined_call_operand.vmem [shape: f32[32,1], index: 10, kind: input, shape index: {}]   ;;  %s1912_s11 = inlined_call_operand.vmem [shape: f32[32,1], index: 11, kind: input, shape index: {}]   ;;  %s1913_s12 = inlined_call_operand.vmem [shape: f32[32,1], index: 12, kind: input, shape index: {}]   ;;  %s1914_s13 = inlined_call_operand.vmem [shape: f32[4,32], index: 13, kind: input, shape index: {}]   ;;  %s1915_s14 = inlined_call_operand.vmem [shape: f32[4,1], index: 14, kind: input, shape index: {}]   ;;  %s1916_s15 = inlined_call_operand.hbm [shape: f32[4,400], index: 15, kind: output, shape index: {}]  }
   0x1   :  { %22 = vsyncpa [#allocation3 + $0x1], 0  ;;  %s1636_s18 = smov 0   ;;  %s1638_s19 = smov 0  }
   0x2   :  { %s1640_s20 = smov 0   ;;  %s1642_s21 = smov 0  }
   0x3 LB: > { %1923 = sst [smem:[#allocation5_spill]] %s1537_s18  ;;  %s1657_s22 = sadd.s32 4294967295, %s1549_s21   ;;  %s1549_s21 = sphi %s1642_s21, %s1934_s21   ;;  %s1545_s20 = sphi %s1640_s20, %s1936_s20   ;;  %s1541_s19 = sphi %s1638_s19, %s1938_s19   ;;  %s1537_s18 = sphi %s1636_s18, %s1937_s18  }
   0x4   : > { %1924 = sst [smem:[#allocation6_spill]] %s1545_s20  ;;  %s1317_s23 = sadd.s32 4294967294, %s1549_s21  }
   0x5   : > { %1925 = sst [smem:[#allocation7_spill]] %s1549_s21  ;;  %s1661_s24 = sadd.s32 1, %s1549_s21  }
   0x6   : > { %1926 = sst [smem:[#allocation8_spill]] %s1661_s24  ;;  %s355_s25 = sadd.s32 1, %s1545_s20 }
   0x7   : > { %s352_s26 = ssub.s32 %s1549_s21, %s1661_s24  ;;  %p365_p0 = scmp.ne.s32.totalorder %s1545_s20, %s1541_s19 }
   0x8   : > { %p353_p1 = scmp.eq.s32.totalorder %s352_s26, 0  ;;  %p366_p2 = scmp.eq.s32.totalorder %s1657_s22, 3 }
   0x9   : > { %p371_p3 = scmp.ne.s32.totalorder %s1541_s19, %s1537_s18  ;;  %p372_p4 = scmp.eq.s32.totalorder %s1317_s23, 3 }
   0xa   : > { %s1672_s27 = scalar_select %p353_p1, %s1545_s20, %s355_s25  }
   0xb   : > { %p1674_p5 = por %p366_p2, %p365_p0  ;;  %p1678_p6 = por %p372_p4, %p371_p3 }
   0xc   : > { %1927 = sst [smem:[#allocation9_spill]] %s1672_s27  ;;  %p1320_p7 = scmp.ge.s32.totalorder %s1549_s21, 1 }
   0xd   : > { %s1929_s29 = scalar_select %p1678_p6, 1, 0 }
   0xe   : > { %p439_p8 = scmp.lt.s32.totalorder %s1549_s21, 5 }
   0xf   : > { %1930 = sst [smem:[#allocation10_spill]] %s1929_s29 }
  0x10   : > { %p440_p9 = pnand %p1320_p7, %p439_p8 }
  0x11   : > { %p486_p10 = scmp.lt.s32.totalorder (!%p440_p9), %s1657_s22, 3  ;;  %v490_v0 = vld [vmem:[%s1902_s1] sm:$0xff] (!%p440_p9)  ;;  %vm519_vm0 = vcmask (!%p440_p9), 31744   ;;  %v1551_v2 = vmov (!%p440_p9), 0   ;;  %v497_v3 = vld [vmem:[%s1903_s2 + $0x10] sm:$0xff] (!%p440_p9)  ;;  %vm532_vm1 = vcmask (!%p440_p9), 1043456  }
  0x12   : > { %443 = sbr.rel (%p440_p9) target bundleno = 1081 (0x439), region = 80  ;;  %1369 = vmatprep.mubr.msk.f32.mxu0 (!%p440_p9), %vm519_vm0, %v490_v0  ;;  %v495_v1 = vld [vmem:[%s1903_s2] sm:$0xff] (!%p440_p9)  ;;  %1479 = vset.pattern.permute.xlu0 (!%p440_p9), %v1551_v2  ;;  %v496_v4 = vld [vmem:[%s1903_s2 + $0x8] sm:$0xff] (!%p440_p9)  ;;  %v498_v5 = vld [vmem:[%s1903_s2 + $0x18] sm:$0xff] (!%p440_p9)  ;;  %vm746_vm2 = vcmask (!%p440_p9), 261120   ;;  %vm1553_vm3 = vmmov (!%p440_p9), 0  }
  0x13   : > { %1480 = vset.pattern.permute.xlu1 (!%p440_p9), %v1551_v2  ;;  %501 = vperm.xlu0 (!%p440_p9), %1479, %v495_v1   ;;  %v491_v7 = vld [vmem:[%s1902_s1 + $0x8] sm:$0xff] (!%p440_p9)  ;;  %v492_v8 = vld [vmem:[%s1902_s1 + $0x10] sm:$0xff] (!%p440_p9)  ;;  %v658_v9 = vld [vmem:[%s1904_s3] sm:$0xff] (!%p440_p9)  ;;  %s483_s18 = sand.u32 (!%p440_p9), 1, %s1541_s19   ;;  %s1338_s21 = sshll.u32 (!%p440_p9), %s1657_s22, 6 }
  0x14   : > { %511 = vperm.xlu1 (!%p440_p9), %1480, %v497_v3   ;;  %v659_v10 = vld [vmem:[%s1904_s3 + $0x8] sm:$0xff] (!%p440_p9)  ;;  %v493_v11 = vld [vmem:[%s1902_s1 + $0x18] sm:$0xff] (!%p440_p9)  ;;  %v686_v12 = vld [vmem:[%s1905_s4] sm:$0xff] (!%p440_p9)  ;;  %s1859_s27 = scalar_lea.hbm (!%p440_p9), %s1916_s15, %s1338_s21 }
  0x15   : > { %v687_v13 = vld [vmem:[%s1905_s4 + $0x8] sm:$0xff] (!%p440_p9)  ;;  %v660_v14 = vld [vmem:[%s1904_s3 + $0x10] sm:$0xff] (!%p440_p9)  ;;  %v661_v15 = vld [vmem:[%s1904_s3 + $0x18] sm:$0xff] (!%p440_p9) }
  0x16   : > { %v688_v16 = vld [vmem:[%s1905_s4 + $0x10] sm:$0xff] (!%p440_p9)  ;;  %v689_v17 = vld [vmem:[%s1905_s4 + $0x18] sm:$0xff] (!%p440_p9)  ;;  %v722_v18 = vld [vmem:[%s1907_s6] sm:$0xff] (!%p440_p9) }
  0x17   : > { %506 = vperm.xlu0 (!%p440_p9), %1479, %v496_v4   ;;  %v723_v19 = vld [vmem:[%s1907_s6 + $0x8] sm:$0xff] (!%p440_p9)  ;;  %v724_v20 = vld [vmem:[%s1907_s6 + $0x10] sm:$0xff] (!%p440_p9)  ;;  %v725_v21 = vld [vmem:[%s1907_s6 + $0x18] sm:$0xff] (!%p440_p9) }
  0x18   : > { %516 = vperm.xlu1 (!%p440_p9), %1480, %v498_v5   ;;  %v881_v22 = vld [vmem:[%s1908_s7] sm:$0xff] (!%p440_p9)  ;;  %v882_v23 = vld [vmem:[%s1908_s7 + $0x8] sm:$0xff] (!%p440_p9)  ;;  %v883_v26 = vld [vmem:[%s1908_s7 + $0x10] sm:$0xff] (!%p440_p9) }
  0x19   : > { %s487_s25 = scalar_select %p486_p10, %s1657_s22, 3  ;;  %v909_v24 = vld [vmem:[%s1909_s8] sm:$0xff]  ;;  %v910_v25 = vld [vmem:[%s1909_s8 + $0x8] sm:$0xff]  ;;  %v884_v27 = vld [vmem:[%s1908_s7 + $0x18] sm:$0xff] }
  0x1a   : > { %v911_v28 = vld [vmem:[%s1909_s8 + $0x10] sm:$0xff]  ;;  %v912_v29 = vld [vmem:[%s1909_s8 + $0x18] sm:$0xff]  ;;  %v945_v30 = vld [vmem:[%s1911_s10] sm:$0xff]  ;;  %s1555_s22 = smov [#allocation2]  }
  0x1b   : > { %s1322_s20 = sshll.u32 %s487_s25, 2  ;;  %664 = vperm.xlu0 %1479, %v658_v9   ;;  %v946_v31 = vld [vmem:[%s1911_s10 + $0x8] sm:$0xff]  ;;  %v947_v32 = vld [vmem:[%s1911_s10 + $0x10] sm:$0xff]  ;;  %v948_v33 = vld [vmem:[%s1911_s10 + $0x18] sm:$0xff]  ;;  %s1245_s25 = scalar_lea.sflag [#allocation3], %s483_s18 }
  0x1c   : > { %s489_s17 = scalar_lea.vmem %s1901_s0, %s1322_s20  ;;  %669 = vperm.xlu1 %1480, %v659_v10   ;;  %v1103_v34 = vld [vmem:[%s1912_s11] sm:$0xff]  ;;  %v1104_v35 = vld [vmem:[%s1912_s11 + $0x8] sm:$0xff]  ;;  %v1105_v38 = vld [vmem:[%s1912_s11 + $0x10] sm:$0xff]  ;;  %s1321_s20 = sshll.u32 %s483_s18, 2 }
  0x1d   : > { %v494_v6 = vld [vmem:[%s489_s17] sm:$0xf]  ;;  %v1132_v37 = vld [vmem:[%s1913_s12 + $0x8] sm:$0xff]  ;;  %v1106_v39 = vld [vmem:[%s1912_s11 + $0x18] sm:$0xff]  ;;  %s485_s24 = scalar_lea.vmem [#allocation2], %s1321_s20  ;;  %s1491_s30 = sshll.u32 %s1555_s22, 4  ;;  %s1492_s30 = int_to_ptr.vmem [resolvable:$false] %s1491_s30 }
  0x1e   : > { %1367 = vmatprep.subr.msk.mxu0 %vm532_vm1, %v494_v6  ;;  %v1131_v36 = vld [vmem:[%s1913_s12] sm:$0xff]  ;;  %v1133_v40 = vld [vmem:[%s1913_s12 + $0x10] sm:$0xff]  ;;  %v1134_v41 = vld [vmem:[%s1913_s12 + $0x18] sm:$0xff]  ;;  %s1258_s29 = sshll.u32 %s485_s24, 4  ;;  %s1493_s16 = scalar_lea.vmem %s1492_s30, 128  ;;  %s1861_s29 = int_to_ptr.vmem [resolvable:$true] %s1258_s29 }
  0x1f   : > { %1368 = vmatpush3.msk.msra.mxu0 %vm532_vm1, %v494_v6  ;;  %692 = vperm.xlu0 %1479, %v686_v12   ;;  %v1164_v42 = vld [vmem:[%s1915_s14] sm:$0xf]  ;;  %s1487_s26 = scalar_lea.vmem %s1861_s29, 64  ;;  %p1494_p0 = scmp.lt.s32.totalorder %s1861_s29, %s1492_s30 }
  0x20   : > { %1370 = vmatmul.mubr.msk.f32.vlgmr.msra.gmra.mrb[0].mxu0 %vm519_vm0, %v491_v7  ;;  %697 = vperm.xlu1 %1480, %v687_v13   ;;  %v718_v43 = vld [vmem:[%s1906_s5] sm:$0xff]  ;;  %p1488_p11 = scmp.ne.s32.totalorder %s1861_s29, %s1487_s26  ;;  %p1495_p1 = scmp.lt.s32.totalorder %s1493_s16, %s1487_s26 }
  0x21   : > { %1372 = vmatprep.mubr.msk.f32.mxu0 %vm519_vm0, %v492_v8  ;;  %1383 = vmatprep.mubr.msk.f32.mxu1 %vm746_vm2, %v718_v43 }
  0x22   : > { %p1489_p12 = pnand %p1488_p11, %p1674_p5  ;;  %p1496_p2 = por %p1495_p1, %p1494_p0 }
  0x23   : > { %674 = vperm.xlu0 %1479, %v660_v14  }
  0x24   : > { %1373 = vmatmul.mubr.msk.f32.gmra.mrb[2].mxu0 %vm519_vm0, %v493_v11  ;;  %679 = vperm.xlu1 %1480, %v661_v15   ;;  %p1490_p13 = pneg %p1489_p12 }
  0x26   : > { %p1497_p3 = pnand %p1496_p2, %p1490_p13 }
  0x27   : > { %702 = vperm.xlu0 %1479, %v688_v16  }
  0x28   : > { %707 = vperm.xlu1 %1480, %v689_v17  }
  0x2b   : > { %728 = vperm.xlu0 %1479, %v722_v18  }
  0x2c   : > { %733 = vperm.xlu1 %1480, %v723_v19  }
  0x2f   : > { %738 = vperm.xlu0 %1479, %v724_v20  }
  0x30   : > { %743 = vperm.xlu1 %1480, %v725_v21  }
  0x33   : > { %887 = vperm.xlu0 %1479, %v881_v22  }
  0x34   : > { %892 = vperm.xlu1 %1480, %v882_v23  }
  0x37   : > { %915 = vperm.xlu0 %1479, %v909_v24  }
  0x38   : > { %920 = vperm.xlu1 %1480, %v910_v25  }
  0x3b   : > { %897 = vperm.xlu0 %1479, %v883_v26  }
  0x3c   : > { %902 = vperm.xlu1 %1480, %v884_v27  }
  0x3f   : > { %925 = vperm.xlu0 %1479, %v911_v28  }
  0x40   : > { %930 = vperm.xlu1 %1480, %v912_v29  }
  0x43   : > { %951 = vperm.xlu0 %1479, %v945_v30  }
  0x44   : > { %956 = vperm.xlu1 %1480, %v946_v31  }
  0x47   : > { %961 = vperm.xlu0 %1479, %v947_v32  }
  0x48   : > { %966 = vperm.xlu1 %1480, %v948_v33  }
  0x4b   : > { %1109 = vperm.xlu0 %1479, %v1103_v34  }
  0x4c   : > { %1114 = vperm.xlu1 %1480, %v1104_v35  }
  0x4f   : > { %1137 = vperm.xlu0 %1479, %v1131_v36  }
  0x50   : > { %1142 = vperm.xlu1 %1480, %v1132_v37  }
  0x53   : > { %1119 = vperm.xlu0 %1479, %v1105_v38  }
  0x54   : > { %1124 = vperm.xlu1 %1480, %v1106_v39  }
  0x57   : > { %1147 = vperm.xlu0 %1479, %v1133_v40  }
  0x58   : > { %1152 = vperm.xlu1 %1480, %v1134_v41  }
  0x5b   : > { %1167 = vperm.xlu0 %1479, %v1164_v42  }
  0x92   : > { %v502_v44 = vpop.permute.xlu0 %501 }
  0x93   : > { %v512_v45 = vpop.permute.xlu1 %511 }
  0x96   : > { %v507_v46 = vpop.permute.xlu0 %506 }
  0x97   : > { %v517_v55 = vpop.permute.xlu1 %516 }
  0x9a   : > { %v665_v22 = vpop.permute.xlu0 %664 }
  0x9b   : > { %v670_v23 = vpop.permute.xlu1 %669 }
  0x9e   : > { %v693_v26 = vpop.permute.xlu0 %692 }
  0x9f   : > { %v698_v27 = vpop.permute.xlu1 %697 }
  0xa2   : > { %v675_v28 = vpop.permute.xlu0 %674 }
  0xa3   : > { %v680_v29 = vpop.permute.xlu1 %679 }
  0xa6   : > { %v703_v39 = vpop.permute.xlu0 %702 }
  0xa7   : > { %v708_v40 = vpop.permute.xlu1 %707 }
  0xf3   : > { %v1371_v47 = vpop.f32.mrb[0].mxu0 }
  0xf4   : > { %v608_v48 = vadd.f32 %v1371_v47, %v507_v46  ;;  %v602_v49 = vpop.f32.mrb[1].mxu0 }
  0xf5   : > { %v603_v50 = vadd.f32 %v602_v49, %v502_v44 }
  0xf6   : > { %v631_v51 = vmul.f32 %v608_v48, %v608_v48 }
  0xf7   : > { %v621_v52 = vadd.f32 %v608_v48, %v603_v50  ;;  %v630_v53 = vmul.f32 %v603_v50, %v603_v50  ;;  %v1374_v54 = vpop.f32.mrb[2].mxu0 }
  0xf8   : > { %v612_v56 = vpop.f32.mrb[3].mxu0  ;;  %v618_v58 = vadd.f32 %v1374_v54, %v517_v55  ;;  %v941_v54 = vld [vmem:[%s1910_s9] sm:$0xff]  ;;  %v729_v55 = vpop.permute.xlu0 %728 }
  0xf9   : > { %v634_v57 = vadd.f32 %v631_v51, %v630_v53  ;;  %v613_v59 = vadd.f32 %v612_v56, %v512_v45  ;;  %v719_v51 = vld [vmem:[%s1906_s5 + $0x8] sm:$0xff]  ;;  %v721_v53 = vld [vmem:[%s1906_s5 + $0x18] sm:$0xff]  ;;  %1397 = vmatprep.mubr.msk.f32.mxu0 %vm746_vm2, %v941_v54  ;;  %v734_v56 = vpop.permute.xlu1 %733 }
  0xfa   : > { %v633_v62 = vmul.f32 %v618_v58, %v618_v58 }
  0xfb   : > { %v622_v60 = vadd.f32 %v621_v52, %v613_v59  ;;  %v632_v61 = vmul.f32 %v613_v59, %v613_v59  ;;  %v720_v52 = vld [vmem:[%s1906_s5 + $0x10] sm:$0xff] }
  0xfd   : > { %v623_v63 = vadd.f32 %v622_v60, %v618_v58  ;;  %v635_v0 = vadd.f32 %v634_v57, %v632_v61 }
  0xff   : > { %v624_v1 = vrot.slane %v623_v63, 4  ;;  %v636_v2 = vadd.f32 %v635_v0, %v633_v62  ;;  %v739_v62 = vpop.permute.xlu0 %738 }
 0x101   : > { %v625_v3 = vadd.f32 %v624_v1, %v623_v63  ;;  %v637_v4 = vrot.slane %v636_v2, 4 }
 0x103   : > { %v626_v5 = vrot.slane %v625_v3, 2  ;;  %v638_v6 = vadd.f32 %v637_v4, %v636_v2  ;;  %v744_v2 = vpop.permute.xlu1 %743 }
 0x105   : > { %v627_v7 = vadd.f32 %v626_v5, %v625_v3  ;;  %v639_v8 = vrot.slane %v638_v6, 2 }
 0x107   : > { %v628_v9 = vrot.slane %v627_v7, 1  ;;  %v640_v10 = vadd.f32 %v639_v8, %v638_v6 }
 0x109   : > { %v629_v11 = vadd.f32 %v628_v9, %v627_v7  ;;  %v641_v12 = vrot.slane %v640_v10, 1 }
 0x10b   : > { %v642_v13 = vadd.f32 %v641_v12, %v640_v10  ;;  %v643_v14 = vmul.f32 0.03125, %v629_v11 }
 0x10d   : > { %v644_v15 = vmul.f32 0.03125, %v642_v13  ;;  %v645_v16 = vmul.f32 %v643_v14, %v643_v14  ;;  %v650_v17 = vsub.f32 %v613_v59, %v643_v14  ;;  %v648_v18 = vsub.f32 %v603_v50, %v643_v14 }
 0x10e   : > { %v649_v19 = vsub.f32 %v608_v48, %v643_v14  ;;  %v651_v20 = vsub.f32 %v618_v58, %v643_v14 }
 0x10f   : > { %v646_v21 = vsub.f32 %v644_v15, %v645_v16 }
 0x111   : > { %v647_v24 = vmax.f32 %v646_v21, 0.0 }
 0x113   : > { %v652_v25 = vadd.f32 1e-05, %v647_v24 }
 0x115   : > { %1481 = vrsqrt.f32 %v652_v25 }
 0x11f   : > { %v1482_v30 = vpop.eup %1481 }
 0x120   : > { %v656_v31 = vmul.f32 %v1482_v30, %v650_v17  ;;  %v654_v32 = vmul.f32 %v1482_v30, %v648_v18  ;;  %v655_v33 = vmul.f32 %v1482_v30, %v649_v19  ;;  %v657_v34 = vmul.f32 %v1482_v30, %v651_v20 }
 0x122   : > { %v682_v35 = vmul.f32 %v665_v22, %v654_v32  ;;  %v683_v36 = vmul.f32 %v670_v23, %v655_v33  ;;  %v684_v37 = vmul.f32 %v675_v28, %v656_v31  ;;  %v685_v38 = vmul.f32 %v680_v29, %v657_v34  ;;  %v888_v33 = vpop.permute.xlu0 %887  ;;  %v893_v34 = vpop.permute.xlu1 %892 }
 0x124   : > { %v710_v41 = vadd.f32 %v693_v26, %v682_v35  ;;  %v711_v42 = vadd.f32 %v698_v27, %v683_v36  ;;  %v712_v43 = vadd.f32 %v703_v39, %v684_v37  ;;  %v713_v44 = vadd.f32 %v708_v40, %v685_v38 }
 0x126   : > { %v714_v45 = vmax.f32 %v710_v41, 0.0  ;;  %v715_v46 = vmax.f32 %v711_v42, 0.0  ;;  %v716_v47 = vmax.f32 %v712_v43, 0.0  ;;  %v717_v48 = vmax.f32 %v713_v44, 0.0  ;;  %v916_v37 = vpop.permute.xlu0 %915  ;;  %v921_v38 = vpop.permute.xlu1 %920 }
 0x128   : > { %v1414_v49 = vpack.c.bf16 %v715_v46, %v714_v45  ;;  %v1418_v50 = vpack.c.bf16 %v717_v48, %v716_v47 }
 0x12a   : > { %1415 = vmatprep.subr.bf16.mxu1 %v1414_v49  ;;  %v898_v39 = vpop.permute.xlu0 %897  ;;  %v903_v40 = vpop.permute.xlu1 %902 }
 0x12b   : > { %1417 = vmatpush3.bf16.msra.mxu1 %v1414_v49 }
 0x12c   : > { %1419 = vmatprep.subr.bf16.mxu1 %v1418_v50 }
 0x12f   : > { %1421 = vmatpush3.bf16.msra.mxu1 %v1418_v50  ;;  %v926_v50 = vpop.permute.xlu0 %925 }
 0x132   : > { %1384 = vmatmul.mubr.msk.f32.vlgmr.msra.gmra.mrb[0].mxu1 %vm746_vm2, %v719_v51  ;;  %v931_v51 = vpop.permute.xlu1 %930 }
 0x133   : > { %1386 = vmatprep.mubr.msk.f32.mxu1 %vm746_vm2, %v720_v52 }
 0x136   : > { %1387 = vmatmul.mubr.msk.f32.gmra.mrb[2].mxu1 %vm746_vm2, %v721_v53 }
 0x205   : > { %v1385_v57 = vpop.f32.mrb[0].mxu1 }
 0x206   : > { %v831_v58 = vadd.f32 %v1385_v57, %v734_v56  ;;  %v825_v59 = vpop.f32.mrb[1].mxu1 }
 0x207   : > { %v826_v60 = vadd.f32 %v825_v59, %v729_v55 }
 0x208   : > { %v854_v61 = vmul.f32 %v831_v58, %v831_v58 }
 0x209   : > { %v844_v63 = vadd.f32 %v831_v58, %v826_v60  ;;  %v853_v0 = vmul.f32 %v826_v60, %v826_v60  ;;  %v1388_v1 = vpop.f32.mrb[2].mxu1 }
 0x20a   : > { %v835_v3 = vpop.f32.mrb[3].mxu1  ;;  %v841_v5 = vadd.f32 %v1388_v1, %v744_v2  ;;  %v1552_v1 = vmov 0.0|0.0   ;;  %v1554_v2 = vmov 0.0  }
 0x20b   : > { %v857_v4 = vadd.f32 %v854_v61, %v853_v0  ;;  %v836_v6 = vadd.f32 %v835_v3, %v739_v62  ;;  %v942_v62 = vld [vmem:[%s1910_s9 + $0x8] sm:$0xff]  ;;  %v944_v0 = vld [vmem:[%s1910_s9 + $0x18] sm:$0xff]  ;;  %1430 = vmatprep.subr.bf16.mxu1 %v1552_v1  ;;  %1411 = vmatprep.mubr.msk.f32.mxu1 %vm1553_vm3, %v1554_v2  ;;  %v952_v3 = vpop.permute.xlu0 %951 }
 0x20c   : > { %v856_v9 = vmul.f32 %v841_v5, %v841_v5 }
 0x20d   : > { %v845_v7 = vadd.f32 %v844_v63, %v836_v6  ;;  %v855_v8 = vmul.f32 %v836_v6, %v836_v6  ;;  %v943_v63 = vld [vmem:[%s1910_s9 + $0x10] sm:$0xff] }
 0x20f   : > { %v846_v10 = vadd.f32 %v845_v7, %v841_v5  ;;  %v858_v11 = vadd.f32 %v857_v4, %v855_v8  ;;  %v957_v4 = vpop.permute.xlu1 %956 }
 0x211   : > { %v847_v12 = vrot.slane %v846_v10, 4  ;;  %v859_v13 = vadd.f32 %v858_v11, %v856_v9 }
 0x213   : > { %v848_v14 = vadd.f32 %v847_v12, %v846_v10  ;;  %v860_v15 = vrot.slane %v859_v13, 4  ;;  %v962_v10 = vpop.permute.xlu0 %961 }
 0x215   : > { %v849_v16 = vrot.slane %v848_v14, 2  ;;  %v861_v17 = vadd.f32 %v860_v15, %v859_v13 }
 0x217   : > { %v850_v18 = vadd.f32 %v849_v16, %v848_v14  ;;  %v862_v19 = vrot.slane %v861_v17, 2  ;;  %v967_v14 = vpop.permute.xlu1 %966 }
 0x219   : > { %v851_v20 = vrot.slane %v850_v18, 1  ;;  %v863_v21 = vadd.f32 %v862_v19, %v861_v17 }
 0x21b   : > { %v852_v22 = vadd.f32 %v851_v20, %v850_v18  ;;  %v864_v23 = vrot.slane %v863_v21, 1 }
 0x21d   : > { %v865_v24 = vadd.f32 %v864_v23, %v863_v21  ;;  %v866_v25 = vmul.f32 0.03125, %v852_v22 }
 0x21f   : > { %v867_v26 = vmul.f32 0.03125, %v865_v24  ;;  %v868_v27 = vmul.f32 %v866_v25, %v866_v25  ;;  %v873_v28 = vsub.f32 %v836_v6, %v866_v25  ;;  %v871_v29 = vsub.f32 %v826_v60, %v866_v25 }
 0x220   : > { %v872_v30 = vsub.f32 %v831_v58, %v866_v25  ;;  %v874_v31 = vsub.f32 %v841_v5, %v866_v25 }
 0x221   : > { %v869_v32 = vsub.f32 %v867_v26, %v868_v27 }
 0x223   : > { %v870_v35 = vmax.f32 %v869_v32, 0.0 }
 0x225   : > { %v875_v36 = vadd.f32 1e-05, %v870_v35 }
 0x227   : > { %1483 = vrsqrt.f32 %v875_v36 }
 0x231   : > { %v1484_v41 = vpop.eup %1483 }
 0x232   : > { %v879_v42 = vmul.f32 %v1484_v41, %v873_v28  ;;  %v877_v43 = vmul.f32 %v1484_v41, %v871_v29  ;;  %v878_v44 = vmul.f32 %v1484_v41, %v872_v30  ;;  %v880_v45 = vmul.f32 %v1484_v41, %v874_v31 }
 0x234   : > { %v905_v46 = vmul.f32 %v888_v33, %v877_v43  ;;  %v906_v47 = vmul.f32 %v893_v34, %v878_v44  ;;  %v907_v48 = vmul.f32 %v898_v39, %v879_v42  ;;  %v908_v49 = vmul.f32 %v903_v40, %v880_v45  ;;  %v1110_v45 = vpop.permute.xlu0 %1109 }
 0x236   : > { %v933_v52 = vadd.f32 %v916_v37, %v905_v46  ;;  %v934_v53 = vadd.f32 %v921_v38, %v906_v47  ;;  %v935_v54 = vadd.f32 %v926_v50, %v907_v48  ;;  %v936_v55 = vadd.f32 %v931_v51, %v908_v49  ;;  %v1115_v46 = vpop.permute.xlu1 %1114 }
 0x238   : > { %v937_v56 = vmax.f32 %v933_v52, 0.0  ;;  %v938_v57 = vmax.f32 %v934_v53, 0.0  ;;  %v939_v58 = vmax.f32 %v935_v54, 0.0  ;;  %v940_v59 = vmax.f32 %v936_v55, 0.0  ;;  %v1138_v49 = vpop.permute.xlu0 %1137 }
 0x23a   : > { %v1422_v60 = vpack.c.bf16 %v938_v57, %v937_v56  ;;  %v1426_v61 = vpack.c.bf16 %v940_v59, %v939_v58  ;;  %v1143_v50 = vpop.permute.xlu1 %1142 }
 0x23c   : > { %1423 = vmatprep.subr.bf16.mxu0 %v1422_v60  ;;  %v1120_v51 = vpop.permute.xlu0 %1119 }
 0x23d   : > { %1425 = vmatpush3.bf16.msra.mxu0 %v1422_v60 }
 0x23e   : > { %1427 = vmatprep.subr.bf16.mxu0 %v1426_v61  ;;  %v1125_v52 = vpop.permute.xlu1 %1124 }
 0x241   : > { %1429 = vmatpush3.bf16.msra.mxu0 %v1426_v61 }
 0x244   : > { %1398 = vmatmul.mubr.msk.f32.vlgmr.msra.gmra.mrb[4].mxu0 %vm746_vm2, %v942_v62  ;;  %v1148_v62 = vpop.permute.xlu0 %1147 }
 0x245   : > { %1400 = vmatprep.mubr.msk.f32.mxu0 %vm746_vm2, %v943_v63  ;;  %v1153_v63 = vpop.permute.xlu1 %1152 }
 0x248   : > { %1401 = vmatmul.mubr.msk.f32.gmra.mrb[6].mxu0 %vm746_vm2, %v944_v0 }
 0x317   : > { %v1399_v5 = vpop.f32.mrb[4].mxu0 }
 0x318   : > { %v1053_v6 = vadd.f32 %v1399_v5, %v957_v4  ;;  %v1047_v7 = vpop.f32.mrb[5].mxu0 }
 0x319   : > { %v1048_v8 = vadd.f32 %v1047_v7, %v952_v3 }
 0x31a   : > { %v1076_v9 = vmul.f32 %v1053_v6, %v1053_v6 }
 0x31b   : > { %v1066_v11 = vadd.f32 %v1053_v6, %v1048_v8  ;;  %v1075_v12 = vmul.f32 %v1048_v8, %v1048_v8  ;;  %v1402_v13 = vpop.f32.mrb[6].mxu0 }
 0x31c   : > { %v1057_v15 = vpop.f32.mrb[7].mxu0  ;;  %v1063_v17 = vadd.f32 %v1402_v13, %v967_v14 }
 0x31d   : > { %v1079_v16 = vadd.f32 %v1076_v9, %v1075_v12  ;;  %v1058_v18 = vadd.f32 %v1057_v15, %v962_v10  ;;  %v1168_v12 = vpop.permute.xlu0 %1167 }
 0x31e   : > { %v1078_v21 = vmul.f32 %v1063_v17, %v1063_v17 }
 0x31f   : > { %v1067_v19 = vadd.f32 %v1066_v11, %v1058_v18  ;;  %v1077_v20 = vmul.f32 %v1058_v18, %v1058_v18  ;;  %v1163_v11 = vld [vmem:[%s1914_s13] sm:$0xf] }
 0x321   : > { %v1068_v22 = vadd.f32 %v1067_v19, %v1063_v17  ;;  %v1080_v23 = vadd.f32 %v1079_v16, %v1077_v20 }
 0x323   : > { %v1069_v24 = vrot.slane %v1068_v22, 4  ;;  %v1081_v25 = vadd.f32 %v1080_v23, %v1078_v21 }
 0x325   : > { %v1070_v26 = vadd.f32 %v1069_v24, %v1068_v22  ;;  %v1082_v27 = vrot.slane %v1081_v25, 4 }
 0x327   : > { %v1071_v28 = vrot.slane %v1070_v26, 2  ;;  %v1083_v29 = vadd.f32 %v1082_v27, %v1081_v25 }
 0x329   : > { %v1072_v30 = vadd.f32 %v1071_v28, %v1070_v26  ;;  %v1084_v31 = vrot.slane %v1083_v29, 2 }
 0x32b   : > { %v1073_v32 = vrot.slane %v1072_v30, 1  ;;  %v1085_v33 = vadd.f32 %v1084_v31, %v1083_v29 }
 0x32d   : > { %v1074_v34 = vadd.f32 %v1073_v32, %v1072_v30  ;;  %v1086_v35 = vrot.slane %v1085_v33, 1 }
 0x32f   : > { %v1087_v36 = vadd.f32 %v1086_v35, %v1085_v33  ;;  %v1088_v37 = vmul.f32 0.03125, %v1074_v34 }
 0x331   : > { %v1089_v38 = vmul.f32 0.03125, %v1087_v36  ;;  %v1090_v39 = vmul.f32 %v1088_v37, %v1088_v37  ;;  %v1095_v40 = vsub.f32 %v1058_v18, %v1088_v37  ;;  %v1093_v41 = vsub.f32 %v1048_v8, %v1088_v37 }
 0x332   : > { %v1094_v42 = vsub.f32 %v1053_v6, %v1088_v37  ;;  %v1096_v43 = vsub.f32 %v1063_v17, %v1088_v37 }
 0x333   : > { %v1091_v44 = vsub.f32 %v1089_v38, %v1090_v39 }
 0x335   : > { %v1092_v47 = vmax.f32 %v1091_v44, 0.0 }
 0x337   : > { %v1097_v48 = vadd.f32 1e-05, %v1092_v47 }
 0x339   : > { %1485 = vrsqrt.f32 %v1097_v48 }
 0x343   : > { %v1486_v53 = vpop.eup %1485 }
 0x344   : > { %v1101_v54 = vmul.f32 %v1486_v53, %v1095_v40  ;;  %v1099_v55 = vmul.f32 %v1486_v53, %v1093_v41  ;;  %v1100_v56 = vmul.f32 %v1486_v53, %v1094_v42  ;;  %v1102_v57 = vmul.f32 %v1486_v53, %v1096_v43 }
 0x346   : > { %v1129_v58 = vmul.f32 %v1120_v51, %v1101_v54  ;;  %v1127_v59 = vmul.f32 %v1110_v45, %v1099_v55  ;;  %v1128_v60 = vmul.f32 %v1115_v46, %v1100_v56  ;;  %v1130_v61 = vmul.f32 %v1125_v52, %v1102_v57 }
 0x348   : > { %v1155_v0 = vadd.f32 %v1138_v49, %v1127_v59  ;;  %v1156_v2 = vadd.f32 %v1143_v50, %v1128_v60  ;;  %v1157_v3 = vadd.f32 %v1148_v62, %v1129_v58  ;;  %v1158_v4 = vadd.f32 %v1153_v63, %v1130_v61 }
 0x34a   : > { %v1159_v5 = vmax.f32 %v1155_v0, 0.0  ;;  %v1160_v6 = vmax.f32 %v1156_v2, 0.0  ;;  %v1161_v7 = vmax.f32 %v1157_v3, 0.0  ;;  %v1162_v8 = vmax.f32 %v1158_v4, 0.0 }
 0x34c   : > { %v1431_v9 = vpack.c.bf16 %v1160_v6, %v1159_v5  ;;  %v1434_v10 = vpack.c.bf16 %v1162_v8, %v1161_v7 }
 0x34e   : > { %1432 = vmatpush3.bf16.msra.mxu1 %v1431_v9 }
 0x34f   : > { %1433 = vmatprep.subr.bf16.mxu1 %v1552_v1 }
 0x352   : > { %1435 = vmatpush3.bf16.msra.mxu1 %v1434_v10 }
 0x355   : > { %1412 = vmatmul.mubr.msk.f32.vlgmr.msra.gmra.mrb[4].mxu1 %vm746_vm2, %v1163_v11 }
 0x428   : > { %v1239_v13 = vpop.f32.mrb[4].mxu1 }
 0x429   : > { %v1240_v14 = vadd.f32 %v1239_v13, %v1168_v12  ;;  %v1413_v15 = vpop.f32.mrb[5].mxu1 }
 0x42b   : > { %1243 = vst [vmem:[%s485_s24] sm:$0xf] %v1240_v14 }
 0x42c   : > { %1500 = shalt.err (!%p1497_p3)
}
 0x42d   : > { %s1501_s18 = scalar_lea.hbm %s1859_s27, 64  ;;  %s1505_s24 = scalar_lea.hbm %s1916_s15, 256 }
 0x42e   : > { %p1502_p4 = scmp.ne.s32.totalorder %s1859_s27, %s1501_s18  ;;  %p1506_p9 = scmp.lt.u32.totalorder %s1859_s27, %s1916_s15 }
 0x42f   : > { %p1507_p10 = scmp.lt.u32.totalorder %s1505_s24, %s1501_s18  ;;  %p1509_p12 = scmp.lt.u32.totalorder %s1501_s18, %s1859_s27 }
 0x430   : > { %p1503_p7 = pnand %p1502_p4, %p1674_p5 }
 0x431   : > { %p1508_p11 = por %p1507_p10, %p1506_p9 }
 0x432   : > { %p1504_p8 = pneg %p1503_p7 }
 0x433   : > { %p1510_p13 = por %p1509_p12, %p1508_p11 }
 0x435   : > { %p1511_p0 = pnand %p1510_p13, %p1504_p8 }
 0x437   : > { %1514 = shalt.err (!%p1511_p0)
}
 0x438   : > { %1436 = dma.vmem_to_hbm [thread:$0]  (%p1674_p5), %s1861_s29, 64, %s1859_s27, %s1245_s25  }
 0x439 PF: > { %s1931_s26 = sld [smem:[#allocation7_spill]]  ;;  %s1932_s22 = sld [smem:[#allocation5_spill]] }
 0x43f   : > { %p1442_p1 = scmp.ge.s32.totalorder %s1931_s26, 2  ;;  %s1270_s16 = sand.u32 1, %s1932_s22  }
 0x440   : > { %s1271_s20 = scalar_lea.sflag [#allocation3], %s1270_s16 }
 0x441   : > { %p1439_p2 = pnand %p1442_p1, %p1678_p6 }
 0x443   : > { %1532 = dma.done.wait (!%p1439_p2), %s1271_s20, 64  }
 0x444   : > { %1534 = vsyncadd (!%p1439_p2), %s1271_s20, 4294967232  ;;  %s1934_s21 = sld [smem:[#allocation8_spill]]  ;;  %s1935_s24 = sld [smem:[#allocation6_spill]] }
 0x445   : > { %s1936_s20 = sld [smem:[#allocation9_spill]]  ;;  %s1937_s18 = smov %s1541_s19 }
 0x44a   : > { %p25_p3 = scmp.ge.s32.totalorder %s1934_s21, 6   ;;  %s1938_s19 = smov %s1935_s24 }
 0x44c   :  { %27 = sbr.rel (!%p25_p3) target bundleno = 3 (0x3), region = 115 }
 0x453   :  { %1276 = vsyncpa [#allocation3], 1 }
 0x454   :  { %1278 = vsyncpa [#allocation3 + $0x1], 1 }

</bundles_post_ra>
